<compile_context>
chip_gen: v6e
topology: v6e:2x2x1
jax: 0.10.0
libtpu: 0.0.40
codegen_flags: <defaults>
</compile_context>

<pallas_src>
import functools

import jax
import jax.numpy as jnp
from jax.experimental import pallas as pl
from jax.experimental.pallas import tpu as pltpu

_MIB = 2 ** 20


# ---------------------------------------------------------------------------
# Kernel 1: attention for one (query-tile, batch) pair over all H heads.
#   q_ref : (tf, 1, H, D)    k_ref/v_ref : (T, 1, H, D)    rel_ref : (tf, T, D)
#   o_ref : (1, tf, E)       w_ref       : (1, tf, T)  (head-averaged, f32)
# ---------------------------------------------------------------------------
def _attn_kernel(q_ref, k_ref, v_ref, rel_ref, o_ref, w_ref, *,
                 scaling, exp_dtype):
    tf, _, H, D = q_ref.shape
    T = k_ref.shape[0]

    q = q_ref[...].reshape(tf, H, D) * scaling       # scaled query (tf, H, D)
    k = k_ref[...].reshape(T, H, D)
    v = v_ref[...].reshape(T, H, D)
    rel = rel_ref[...]                               # (tf, T, D)

    # scores[f, h, t]: QK term (batched over h, M=tf, N=T on the MXU) plus the
    # relative-position term (batched over f -- inherently per-f weight
    # pushes; f-leading layout avoids extra score-sized relayouts).
    s = jnp.einsum('fhd,thd->fht', q, k, preferred_element_type=jnp.float32)
    s = s + jnp.einsum('fhd,ftd->fht', q, rel,
                       preferred_element_type=jnp.float32)

    # softmax over the source dim; max-subtraction and denominator in f32,
    # exp optionally in bf16 (only when inputs are bf16).
    m = jnp.max(s, axis=-1, keepdims=True)
    e = jnp.exp((s - m).astype(exp_dtype))
    denom = jnp.sum(e, axis=-1, keepdims=True, dtype=jnp.float32)  # (tf,H,1)

    # EUP approximate reciprocal + two Newton steps on the tiny (tf, H, 1)
    # tensor -> ~f32 accuracy at negligible VPU cost.
    inv = pl.reciprocal(denom, approx=True)
    inv = inv * (2.0 - denom * inv)
    inv = inv * (2.0 - denom * inv)
    p = e.astype(jnp.float32) * inv                  # (tf, H, T) f32

    # attn[f,h,d] = sum_t p * v  +  sum_t p * rel   (f32 accumulation)
    p_lo = p.astype(v.dtype)
    attn = jnp.einsum('fht,thd->fhd', p_lo, v,
                      preferred_element_type=jnp.float32)
    attn = attn + jnp.einsum('fht,ftd->fhd', p_lo, rel,
                             preferred_element_type=jnp.float32)

    # lane-dense (tf, E) write, heads packed head-major (matches torch .view)
    o_ref[...] = attn.reshape(1, tf, H * D).astype(o_ref.dtype)
    # head-averaged attention weights, kept in float32
    w_ref[...] = (jnp.sum(p, axis=1) * (1.0 / H)).reshape(1, tf, T).astype(
        w_ref.dtype)


def _attn_vmem_bytes(T, tf, H, D, E, in_it, rel_it, out_it):
    """Rough per-step VMEM: double-buffered pipeline blocks + f32 temporaries."""
    blocks = 2 * ((tf + 2 * T) * H * D * in_it       # q + k + v
                  + tf * T * D * rel_it              # rel tile
                  + tf * E * out_it                  # attention output tile
                  + tf * T * 4)                      # f32 weights tile
    temps = 6 * tf * H * T * 4 + 4 * tf * H * D * 4  # s / e / p / p_lo / attn
    return int(blocks + temps)


def _choose_q_tile(T, H, D, E, in_it, rel_it, out_it, budget_bytes):
    """Largest sublane-aligned divisor of T whose VMEM estimate fits budget."""
    cands = sorted({t for t in range(8, T + 1, 8) if T % t == 0}, reverse=True)
    if not cands:
        return T                       # tiny / odd T: one full block is legal
    for t in cands:
        if _attn_vmem_bytes(T, t, H, D, E, in_it, rel_it, out_it) <= budget_bytes:
            return t
    # TODO(synk): if even tf=8 misses the budget (huge T*E), the source dim
    # must also be tiled (online softmax).
    return cands[-1]


# ---------------------------------------------------------------------------
# Kernel 2: tiled output projection  y = x @ W.T + b   (W passed untransposed)
# ---------------------------------------------------------------------------
def _out_proj_kernel(x_ref, w_ref, b_ref, o_ref, acc_ref):
    @pl.when(pl.program_id(2) == 0)
    def _():
        acc_ref[...] = jnp.zeros_like(acc_ref)

    # contract x's dim 1 with W's dim 1 (the MXU consumes a transposed RHS
    # natively; no wrapper-side E x E transpose pass).
    acc_ref[...] += jax.lax.dot_general(
        x_ref[...], w_ref[...],
        dimension_numbers=(((1,), (1,)), ((), ())),
        preferred_element_type=jnp.float32)

    @pl.when(pl.program_id(2) == pl.num_programs(2) - 1)
    def _():
        o_ref[...] = (acc_ref[...]
                      + b_ref[...].astype(jnp.float32)).astype(o_ref.dtype)


def _tile(dim, preferred, align):
    """Largest block <= preferred that divides dim and is a multiple of align.

    Falls back to the full dim (always legal) only if no aligned divisor
    exists.  TODO(synk): pad + mask awkward sizes instead of a full-dim block.
    """
    if dim <= preferred:
        return dim
    t = (preferred // align) * align
    while t >= align:
        if dim % t == 0:
            return t
        t -= align
    return dim


def _out_proj(x, w, bias, tm=512, tn=256, tk=512):
    M, K = x.shape
    N = w.shape[0]
    tm = _tile(M, tm, 8)
    tn = _tile(N, tn, 128)
    tk = _tile(K, tk, 128)
    b2 = bias.reshape(1, N)
    it = x.dtype.itemsize
    w_it = w.dtype.itemsize

    est = (2 * (tm * tk * it + tn * tk * w_it + tn * bias.dtype.itemsize)
           + 2 * tm * tn * it + tm * tn * 4)
    vmem_limit = int(min(max(2 * est, 32 * _MIB), 96 * _MIB))

    return pl.pallas_call(
        _out_proj_kernel,
        out_shape=jax.ShapeDtypeStruct((M, N), x.dtype),
        grid=(M // tm, N // tn, K // tk),
        in_specs=[pl.BlockSpec((tm, tk), lambda i, j, k: (i, k)),
                  pl.BlockSpec((tn, tk), lambda i, j, k: (j, k)),
                  pl.BlockSpec((1, tn), lambda i, j, k: (0, j))],
        out_specs=pl.BlockSpec((tm, tn), lambda i, j, k: (i, j)),
        scratch_shapes=[pltpu.VMEM((tm, tn), jnp.float32)],
        compiler_params=pltpu.CompilerParams(
            dimension_semantics=("parallel", "parallel", "arbitrary"),
            vmem_limit_bytes=vmem_limit),
        cost_estimate=pl.CostEstimate(
            flops=2 * M * K * N,
            transcendentals=0,
            bytes_accessed=(M * K + K * N + M * N + N) * it),
    )(x, w, b2)


# ---------------------------------------------------------------------------
# Wrapper reproducing MultiheadAttention.forward semantics
# ---------------------------------------------------------------------------
def multihead_attention_forward(query, key, value, relative_position_keys,
                                out_proj_weight, out_proj_bias, num_heads,
                                *, q_tile=None, vmem_budget_bytes=48 * _MIB):
    T, B, E = key.shape
    H = num_heads
    D = E // H
    assert D * H == E
    scaling = D ** (-0.5)

    in_it = query.dtype.itemsize
    rel_it = relative_position_keys.dtype.itemsize
    out_it = in_it

    # Free reshapes only: (T, B, E) -> (T, B, H, D).  No HBM transposes.
    q4 = query.reshape(T, B, H, D)
    k4 = key.reshape(T, B, H, D)
    v4 = value.reshape(T, B, H, D)

    tf = q_tile if q_tile is not None else _choose_q_tile(
        T, H, D, E, in_it, rel_it, out_it, vmem_budget_bytes)
    nf = T // tf

    est = _attn_vmem_bytes(T, tf, H, D, E, in_it, rel_it, out_it)
    attn_vmem_limit = int(min(max(est * 5 // 4, 32 * _MIB), 96 * _MIB))

    # exp in bf16 only for bf16 inputs (v6e/v7x EUP bf16 path); f32 otherwise.
    # TODO(synk): force f32 exp on v5e even for bf16 inputs (no bf16 EUP).
    exp_dtype = jnp.bfloat16 if query.dtype == jnp.bfloat16 else jnp.float32

    attn_bte, attn_weights = pl.pallas_call(
        functools.partial(_attn_kernel, scaling=scaling, exp_dtype=exp_dtype),
        out_shape=(jax.ShapeDtypeStruct((B, T, E), query.dtype),
                   jax.ShapeDtypeStruct((B, T, T), jnp.float32)),
        grid=(nf, B),                       # f-tiles outer, batch inner
        in_specs=[pl.BlockSpec((tf, 1, H, D), lambda f, b: (f, b, 0, 0)),
                  pl.BlockSpec((T, 1, H, D), lambda f, b: (0, b, 0, 0)),
                  pl.BlockSpec((T, 1, H, D), lambda f, b: (0, b, 0, 0)),
                  pl.BlockSpec((tf, T, D), lambda f, b: (f, 0, 0))],
        out_specs=(pl.BlockSpec((1, tf, E), lambda f, b: (b, f, 0)),
                   pl.BlockSpec((1, tf, T), lambda f, b: (b, f, 0))),
        compiler_params=pltpu.CompilerParams(
            dimension_semantics=("parallel", "parallel"),
            vmem_limit_bytes=attn_vmem_limit),
        cost_estimate=pl.CostEstimate(
            flops=8 * B * H * T * T * D,
            transcendentals=B * H * T * T,
            bytes_accessed=(B * T * E * in_it                 # q
                            + 2 * nf * B * T * E * in_it      # k, v per f-tile
                            + T * T * D * rel_it              # rel
                            + B * T * E * in_it               # attn out
                            + B * T * T * 4)),                # weights out
    )(q4, k4, v4, relative_position_keys)

    # Output projection over tokens (rows ordered (b, t)); projection is
    # per-token so the order is undone once at the end.
    x = attn_bte.reshape(B * T, E)
    y = _out_proj(x, out_proj_weight, out_proj_bias)
    # TODO(synk): fuse this single extra HBM pass into the out-projection once
    # a lane-safe (T, B, E) output block layout is available.
    attn = jnp.transpose(y.reshape(B, T, E), (1, 0, 2))        # -> (T, B, E)

    # need_weights=True: head-averaged weights computed in-kernel (float32).
    return attn, attn_weights


# ---------------------------------------------------------------------------
# Pure-JAX reference (mirrors the PyTorch forward) for the correctness check
# ---------------------------------------------------------------------------
def reference_forward(query, key, value, rel, W, b, num_heads):
    T, B, E = key.shape
    H = num_heads
    D = E // H
    scaling = D ** (-0.5)
    q = (query * scaling).reshape(T, B * H, D).transpose(1, 0, 2)
    k = key.reshape(T, B * H, D).transpose(1, 0, 2)
    v = value.reshape(T, B * H, D).transpose(1, 0, 2)
    s = jnp.einsum('btd,bsd->bts', q, k)
    s = s + jnp.einsum('bfd,ftd->bft', q, rel)
    p = jax.nn.softmax(s, axis=-1)
    a = jnp.einsum('bts,bsd->btd', p, v)
    a = a + jnp.einsum('bft,ftd->bfd', p, rel)
    a = a.transpose(1, 0, 2).reshape(T, B, E)
    out = a @ W.T + b
    w_avg = p.reshape(B, H, T, T).sum(axis=1) / H
    return out, w_avg


if __name__ == "__main__":
    # Small shapes consistent with the module: Time x Batch x Channel
    T, B, E, H = 8, 2, 32, 4
    D = E // H

    key0 = jax.random.PRNGKey(0)
    k1, k2, k3, k4, k5 = jax.random.split(key0, 5)

    query = jax.random.normal(k1, (T, B, E), dtype=jnp.float32)
    keyx = jax.random.normal(k2, (T, B, E), dtype=jnp.float32)
    value = jax.random.normal(k3, (T, B, E), dtype=jnp.float32)
    rel_pos_keys = jax.random.normal(k4, (T, T, D), dtype=jnp.float32)

    # Deterministic parameter init (matches reset_parameters: normal(0, 0.02),
    # bias = 0). in_proj_weight is unused by forward() and therefore omitted.
    out_proj_weight = 0.02 * jax.random.normal(k5, (E, E), dtype=jnp.float32)
    out_proj_bias = jnp.zeros((E,), dtype=jnp.float32)

    attn, attn_weights = multihead_attention_forward(
        query, keyx, value, rel_pos_keys, out_proj_weight, out_proj_bias, H)
    jax.block_until_ready((attn, attn_weights))

    ref_attn, ref_weights = reference_forward(
        query, keyx, value, rel_pos_keys, out_proj_weight, out_proj_bias, H)

    assert attn.shape == (T, B, E)
    assert attn_weights.shape == (B, T, T)
    assert jnp.allclose(attn, ref_attn, atol=2e-4, rtol=2e-4)
    assert jnp.allclose(attn_weights, ref_weights, atol=2e-4, rtol=2e-4)

    print("KERNEL_OK")
</pallas_src>

<mosaic_0001>
module attributes {stable_mosaic.version = 11 : i64} {
  func.func @_attn_kernel(%arg0: i32, %arg1: i32, %arg2: memref<8x1x4x8xf32, #tpu.memory_space<vmem>>, %arg3: memref<8x1x4x8xf32, #tpu.memory_space<vmem>>, %arg4: memref<8x1x4x8xf32, #tpu.memory_space<vmem>>, %arg5: memref<8x8x8xf32, #tpu.memory_space<vmem>>, %arg6: memref<1x8x32xf32, #tpu.memory_space<vmem>>, %arg7: memref<1x8x8xf32, #tpu.memory_space<vmem>>) attributes {dimension_semantics = [#tpu.dimension_semantics<parallel>, #tpu.dimension_semantics<parallel>], iteration_bounds = array<i64: 1, 2>, scalar_prefetch = 0 : i64, scratch_operands = 0 : i64, tpu.core_type = #tpu.core_type<tc>, window_params = [{transform_indices = @transform_0, window_bounds = array<i64: 8, 1, 4, 8>}, {transform_indices = @transform_1, window_bounds = array<i64: 8, 1, 4, 8>}, {transform_indices = @transform_2, window_bounds = array<i64: 8, 1, 4, 8>}, {transform_indices = @transform_3, window_bounds = array<i64: 8, 8, 8>}, {transform_indices = @transform_4, window_bounds = array<i64: 1, 8, 32>}, {transform_indices = @transform_5, window_bounds = array<i64: 1, 8, 8>}]} {
    %c0 = arith.constant 0 : index
    %c0_0 = arith.constant 0 : index
    %c0_1 = arith.constant 0 : index
    %c0_2 = arith.constant 0 : index
    %0 = vector.load %arg2[%c0, %c0_0, %c0_1, %c0_2] : memref<8x1x4x8xf32, #tpu.memory_space<vmem>>, vector<8x1x4x8xf32>
    %1 = vector.shape_cast %0 : vector<8x1x4x8xf32> to vector<8x4x8xf32>
    %cst = arith.constant 0.353553385 : f32
    %2 = vector.broadcast %cst : f32 to vector<8x4x8xf32>
    %3 = arith.mulf %1, %2 : vector<8x4x8xf32>
    %c0_3 = arith.constant 0 : index
    %c0_4 = arith.constant 0 : index
    %c0_5 = arith.constant 0 : index
    %c0_6 = arith.constant 0 : index
    %4 = vector.load %arg3[%c0_3, %c0_4, %c0_5, %c0_6] : memref<8x1x4x8xf32, #tpu.memory_space<vmem>>, vector<8x1x4x8xf32>
    %5 = vector.shape_cast %4 : vector<8x1x4x8xf32> to vector<8x4x8xf32>
    %c0_7 = arith.constant 0 : index
    %c0_8 = arith.constant 0 : index
    %c0_9 = arith.constant 0 : index
    %c0_10 = arith.constant 0 : index
    %6 = vector.load %arg4[%c0_7, %c0_8, %c0_9, %c0_10] : memref<8x1x4x8xf32, #tpu.memory_space<vmem>>, vector<8x1x4x8xf32>
    %7 = vector.shape_cast %6 : vector<8x1x4x8xf32> to vector<8x4x8xf32>
    %c0_11 = arith.constant 0 : index
    %c0_12 = arith.constant 0 : index
    %c0_13 = arith.constant 0 : index
    %8 = vector.load %arg5[%c0_11, %c0_12, %c0_13] : memref<8x8x8xf32, #tpu.memory_space<vmem>>, vector<8x8x8xf32>
    "tpu.trace_start"() <{level = 10 : i32, message = "fhd,thd->fht"}> : () -> ()
    %cst_14 = arith.constant dense<0.000000e+00> : vector<4x8x8xf32>
    %9 = tpu.matmul %5, %3, %cst_14 {dimension_numbers = #tpu.dot_dimension_numbers<[2], [2], [0], [0], [0, 1, 0, 0, 1, 0], [1], [1]>} : vector<8x4x8xf32>, vector<8x4x8xf32>, vector<4x8x8xf32> -> vector<4x8x8xf32>
    %10 = tpu.transpose %9, [2, 0, 1] : vector<4x8x8xf32> -> vector<8x4x8xf32>
    "tpu.trace_stop"() : () -> ()
    "tpu.trace_start"() <{level = 10 : i32, message = "fhd,ftd->fht"}> : () -> ()
    %cst_15 = arith.constant dense<0.000000e+00> : vector<8x4x8xf32>
    %11 = tpu.matmul %3, %8, %cst_15 {dimension_numbers = #tpu.dot_dimension_numbers<[2], [2], [1], [1], [0, 0, 0, 1, 1, 1], [0], [0]>} : vector<8x4x8xf32>, vector<8x8x8xf32>, vector<8x4x8xf32> -> vector<8x4x8xf32>
    "tpu.trace_stop"() : () -> ()
    %12 = arith.addf %10, %11 : vector<8x4x8xf32>
    %cst_16 = arith.constant dense<0xFF800000> : vector<8x4xf32>
    %13 = vector.multi_reduction <maximumf>, %12, %cst_16 [2] : vector<8x4x8xf32> to vector<8x4xf32>
    %14 = vector.shape_cast %13 : vector<8x4xf32> to vector<8x4x1xf32>
    %15 = vector.broadcast %14 : vector<8x4x1xf32> to vector<8x4x8xf32>
    %16 = arith.subf %12, %15 : vector<8x4x8xf32>
    %17 = math.exp %16 : vector<8x4x8xf32>
    %cst_17 = arith.constant dense<0.000000e+00> : vector<8x4xf32>
    %18 = vector.multi_reduction <add>, %17, %cst_17 [2] : vector<8x4x8xf32> to vector<8x4xf32>
    %19 = vector.shape_cast %18 : vector<8x4xf32> to vector<8x4x1xf32>
    %20 = tpu.reciprocal %19 {approx = true} : vector<8x4x1xf32> -> vector<8x4x1xf32>
    %21 = arith.mulf %19, %20 : vector<8x4x1xf32>
    %cst_18 = arith.constant 2.000000e+00 : f32
    %22 = vector.broadcast %cst_18 : f32 to vector<8x4x1xf32>
    %23 = arith.subf %22, %21 : vector<8x4x1xf32>
    %24 = arith.mulf %20, %23 : vector<8x4x1xf32>
    %25 = arith.mulf %19, %24 : vector<8x4x1xf32>
    %cst_19 = arith.constant 2.000000e+00 : f32
    %26 = vector.broadcast %cst_19 : f32 to vector<8x4x1xf32>
    %27 = arith.subf %26, %25 : vector<8x4x1xf32>
    %28 = arith.mulf %24, %27 : vector<8x4x1xf32>
    %29 = vector.broadcast %28 : vector<8x4x1xf32> to vector<8x4x8xf32>
    %30 = arith.mulf %17, %29 : vector<8x4x8xf32>
    "tpu.trace_start"() <{level = 10 : i32, message = "fht,thd->fhd"}> : () -> ()
    %cst_20 = arith.constant dense<0.000000e+00> : vector<4x8x8xf32>
    %31 = tpu.matmul %7, %30, %cst_20 {dimension_numbers = #tpu.dot_dimension_numbers<[0], [2], [2], [0], [0, 1, 0, 2, 1, 0], [1], [1]>} : vector<8x4x8xf32>, vector<8x4x8xf32>, vector<4x8x8xf32> -> vector<4x8x8xf32>
    %32 = tpu.transpose %31, [2, 0, 1] : vector<4x8x8xf32> -> vector<8x4x8xf32>
    "tpu.trace_stop"() : () -> ()
    "tpu.trace_start"() <{level = 10 : i32, message = "fht,ftd->fhd"}> : () -> ()
    %cst_21 = arith.constant dense<0.000000e+00> : vector<8x4x8xf32>
    %33 = tpu.matmul %30, %8, %cst_21 {dimension_numbers = #tpu.dot_dimension_numbers<[2], [1], [1], [2], [0, 0, 0, 1, 1, 2], [0], [0]>} : vector<8x4x8xf32>, vector<8x8x8xf32>, vector<8x4x8xf32> -> vector<8x4x8xf32>
    "tpu.trace_stop"() : () -> ()
    %34 = arith.addf %32, %33 : vector<8x4x8xf32>
    %35 = vector.shape_cast %34 : vector<8x4x8xf32> to vector<1x8x32xf32>
    %c0_22 = arith.constant 0 : index
    %c0_23 = arith.constant 0 : index
    %c0_24 = arith.constant 0 : index
    %36 = vector.load %arg6[%c0_22, %c0_23, %c0_24] : memref<1x8x32xf32, #tpu.memory_space<vmem>>, vector<1x8x32xf32>
    tpu.vector_store %arg6[%c0_22, %c0_23, %c0_24], %35 {strides = array<i32>} : memref<1x8x32xf32, #tpu.memory_space<vmem>>, vector<1x8x32xf32>,
    %cst_25 = arith.constant dense<0.000000e+00> : vector<8x8xf32>
    %37 = vector.multi_reduction <add>, %30, %cst_25 [1] : vector<8x4x8xf32> to vector<8x8xf32>
    %cst_26 = arith.constant 2.500000e-01 : f32
    %38 = vector.broadcast %cst_26 : f32 to vector<8x8xf32>
    %39 = arith.mulf %37, %38 : vector<8x8xf32>
    %40 = vector.shape_cast %39 : vector<8x8xf32> to vector<1x8x8xf32>
    %c0_27 = arith.constant 0 : index
    %c0_28 = arith.constant 0 : index
    %c0_29 = arith.constant 0 : index
    %41 = vector.load %arg7[%c0_27, %c0_28, %c0_29] : memref<1x8x8xf32, #tpu.memory_space<vmem>>, vector<1x8x8xf32>
    tpu.vector_store %arg7[%c0_27, %c0_28, %c0_29], %40 {strides = array<i32>} : memref<1x8x8xf32, #tpu.memory_space<vmem>>, vector<1x8x8xf32>,
    return
  }
  func.func @transform_0(%arg0: i32, %arg1: i32) -> (i32, i32, i32, i32) {
    %c0_i32 = arith.constant 0 : i32
    %c0_i32_0 = arith.constant 0 : i32
    %c0_i32_1 = arith.constant 0 : i32
    return %arg0, %arg1, %c0_i32, %c0_i32_0 : i32, i32, i32, i32
  }
  func.func @transform_1(%arg0: i32, %arg1: i32) -> (i32, i32, i32, i32) {
    %c0_i32 = arith.constant 0 : i32
    %c0_i32_0 = arith.constant 0 : i32
    %c0_i32_1 = arith.constant 0 : i32
    %c0_i32_2 = arith.constant 0 : i32
    return %c0_i32, %arg1, %c0_i32_0, %c0_i32_1 : i32, i32, i32, i32
  }
  func.func @transform_2(%arg0: i32, %arg1: i32) -> (i32, i32, i32, i32) {
    %c0_i32 = arith.constant 0 : i32
    %c0_i32_0 = arith.constant 0 : i32
    %c0_i32_1 = arith.constant 0 : i32
    %c0_i32_2 = arith.constant 0 : i32
    return %c0_i32, %arg1, %c0_i32_0, %c0_i32_1 : i32, i32, i32, i32
  }
  func.func @transform_3(%arg0: i32, %arg1: i32) -> (i32, i32, i32) {
    %c0_i32 = arith.constant 0 : i32
    %c0_i32_0 = arith.constant 0 : i32
    %c0_i32_1 = arith.constant 0 : i32
    return %arg0, %c0_i32, %c0_i32_0 : i32, i32, i32
  }
  func.func @transform_4(%arg0: i32, %arg1: i32) -> (i32, i32, i32) {
    %c0_i32 = arith.constant 0 : i32
    %c0_i32_0 = arith.constant 0 : i32
    return %arg1, %arg0, %c0_i32 : i32, i32, i32
  }
  func.func @transform_5(%arg0: i32, %arg1: i32) -> (i32, i32, i32) {
    %c0_i32 = arith.constant 0 : i32
    %c0_i32_0 = arith.constant 0 : i32
    return %arg1, %arg0, %c0_i32 : i32, i32, i32
  }
}

</mosaic_0001>

<bundles_post_ra>
// kernel: tpu_custom_call.1
= control target key start
LH: loop header
LB: loop body
LE: loop exit
PB: predicated region body
PF: predicated region fallthrough
CT: control target
= control target key end

     0   :  { %s6641_s0 = inlined_call_operand.hbm [shape: f32[8,2,4,8], index: 0, kind: input, shape index: {}]   ;;  %s6642_s1 = inlined_call_operand.hbm [shape: f32[8,2,4,8], index: 1, kind: input, shape index: {}]   ;;  %s6643_s2 = inlined_call_operand.hbm [shape: f32[8,2,4,8], index: 2, kind: input, shape index: {}]   ;;  %s6644_s3 = inlined_call_operand.hbm [shape: f32[8,8,8], index: 3, kind: input, shape index: {}]   ;;  %s6645_s4 = inlined_call_operand.hbm [shape: f32[2,8,32], index: 4, kind: output, shape index: {0}]   ;;  %s6646_s5 = inlined_call_operand.hbm [shape: f32[2,8,8], index: 5, kind: output, shape index: {1}]  }
   0x1   :  { %6661 = sst [smem:[#allocation23_spill]] %s6641_s0 }
   0x2   :  { %6662 = sst [smem:[#allocation24_spill]] %s6642_s1 }
   0x3   :  { %11 = vsyncpa [#allocation3], 0 }
   0x4   :  { %13 = vsyncpa [#allocation3 + $0x1], 0 }
   0x5   :  { %14 = vsyncpa [#allocation6], 0 }
   0x6   :  { %16 = vsyncpa [#allocation6 + $0x1], 0 }
   0x7   :  { %17 = vsyncpa [#allocation9], 0 }
   0x8   :  { %18 = vsyncpa [#allocation4], 0 }
   0x9   :  { %20 = vsyncpa [#allocation4 + $0x1], 0 }
   0xa   :  { %21 = vsyncpa [#allocation12], 0 }
   0xb   :  { %23 = vsyncpa [#allocation12 + $0x1], 0  ;;  %s5974_s18 = smov 0   ;;  %s5976_s19 = smov 0  }
   0xc   :  { %s5978_s20 = smov 0   ;;  %s5980_s21 = smov 0  }
   0xd   :  { %s5982_s22 = smov 0   ;;  %s5984_s23 = smov 0  }
   0xe LB: > { %6663 = sst [smem:[#allocation18_spill]] %s5913_s20  ;;  %s38_s24 = sadd.s32 1, %s5921_s22  ;;  %s5925_s23 = sphi %s5984_s23, %s29_s23   ;;  %s5921_s22 = sphi %s5982_s22, %s6689_s22   ;;  %s5917_s21 = sphi %s5980_s21, %s6688_s21   ;;  %s5913_s20 = sphi %s5978_s20, %s6687_s20   ;;  %s5909_s19 = sphi %s5976_s19, %s6691_s19   ;;  %s5905_s18 = sphi %s5974_s18, %s6690_s18  }
   0xf   : > { %6664 = sst [smem:[#allocation19_spill]] %s5921_s22  ;;  %s50_s25 = sadd.s32 1, %s5913_s20 }
  0x10   : > { %6665 = sst [smem:[#allocation20_spill]] %s5925_s23  ;;  %p39_p0 = scmp.ge.s32.totalorder %s38_s24, 2 }
  0x11   : > { %p57_p1 = scmp.ne.s32.totalorder %s5913_s20, %s5909_s19  ;;  %p58_p2 = scmp.eq.s32.totalorder %s5925_s23, 0 }
  0x12   : > { %s6693_s24 = smov (%p39_p0, %s38_s24), 0  ;;  %p5590_p5 = scmp.lt.s32.totalorder %s5925_s23, 2 }
  0x13   : > { %6666 = sst [smem:[#allocation21_spill]] %s6693_s24  ;;  %p59_p3 = por %p58_p2, %p57_p1 }
  0x14   : > { %s46_s26 = ssub.s32 %s5921_s22, %s6693_s24  ;;  %s6653_s27 = sand.u32 1, %s5913_s20  }
  0x15   : > { %p48_p6 = scmp.eq.s32.totalorder %s46_s26, 0  ;;  %s6021_s28 = sshll.u32 %s6653_s27, 5 }
  0x16   : > { %s6024_s29 = sshll.u32 %s5921_s22, 6  ;;  %p6029_p7 = pnand %p5590_p5, %p59_p3 }
  0x17   : > { %s6027_s30 = scalar_select %p48_p6, %s5913_s20, %s50_s25  }
  0x18   : > { %s260_s7 = sand.u32 1, %s5925_s23   ;;  %s6669_s1 = sld [smem:[#allocation24_spill]] }
  0x19   : > { %6667 = sst [smem:[#allocation22_spill]] %s6027_s30  ;;  %s264_s11 = scalar_lea.vmem [#allocation5], %s6021_s28 }
  0x1a   : > { %s270_s12 = sshll.u32 %s264_s11, 4  ;;  %s6039_s13 = scalar_lea.sflag [#allocation6], %s260_s7  ;;  %s271_s12 = int_to_ptr.vmem [resolvable:$true] %s270_s12 }
  0x1b   : > { %p6657_p8 = pneg %p6029_p7  ;;  %s5710_s14 = scalar_lea.vmem %s271_s12, 512 }
  0x1c   : > { %p5711_p9 = scmp.ne.s32.totalorder %s271_s12, %s5710_s14  ;;  %s5927_s15 = smov [#allocation5]  }
  0x1d   : > { %s5715_s16 = sshll.u32 %s5927_s15, 4  ;;  %s5716_s16 = int_to_ptr.vmem [resolvable:$false] %s5715_s16 }
  0x1e   : > { %s269_s10 = scalar_lea.hbm %s6669_s1, %s6024_s29  ;;  %p5713_p10 = pnand %p5711_p9, %p6657_p8 }
  0x1f   : > { %s5717_s17 = scalar_lea.vmem %s5716_s16, 1024  ;;  %p5718_p12 = scmp.lt.s32.totalorder %s271_s12, %s5716_s16 }
  0x20   : > { %p5714_p11 = pneg %p5713_p10  ;;  %p5719_p13 = scmp.lt.s32.totalorder %s5717_s17, %s5710_s14 }
  0x22   : > { %p5720_p0 = por %p5719_p13, %p5718_p12 }
  0x24   : > { %p5721_p2 = pnand %p5720_p0, %p5714_p11 }
  0x26   : > { %5724 = shalt.err (!%p5721_p2)
}
  0x27   : > { %s6647_s25 = smov 128   ;;  %s6649_s26 = smov 64  }
  0x28   : > { %s6651_s7 = smov 4   ;;  %s6053_s8 = sadd.s32 4294967295, %s5925_s23  }
  0x29   : > { %5578 = dma.hbm_to_vmem [thread:$0]  (!%p6029_p7), %s269_s10, 512, %s271_s12, %s6039_s13, %s6647_s25, %s6649_s26, %s6651_s7  }
  0x2a   : > { %s5331_s9 = sadd.s32 4294967294, %s5925_s23   ;;  %p63_p3 = scmp.ne.s32.totalorder %s5909_s19, %s5905_s18 }
  0x2b   : > { %p6656_p5 = scmp.eq.s32.totalorder %s6053_s8, 0  ;;  %p167_p6 = scmp.eq.s32.totalorder %s6053_s8, 1 }
  0x2c   : > { %p173_p9 = scmp.eq.s32.totalorder %s5331_s9, 1  ;;  %p5332_p11 = scmp.ge.s32.totalorder %s5925_s23, 1 }
  0x2d   : > { %p6062_p10 = por %p6656_p5, %p63_p3  ;;  %p6070_p12 = por %p167_p6, %p57_p1 }
  0x2e   : > { %p6074_p13 = por %p173_p9, %p63_p3  ;;  %p208_p0 = scmp.lt.s32.totalorder %s5925_s23, 3 }
  0x2f   : > { %s5931_s15 = smov [#allocation8]   ;;  %s6674_s0 = sld [smem:[#allocation23_spill]] }
  0x30   : > { %s6672_s12 = scalar_select %p6074_p13, 1, 0 }
  0x31   : > { %p6079_p2 = pnand %p5332_p11, %p208_p0  ;;  %s223_s16 = sshll.u32 %s5931_s15, 4  ;;  %s6083_s16 = int_to_ptr.vmem [resolvable:$true] %s223_s16 }
  0x32   : > { %s241_s26 = scalar_lea.vmem [#allocation2], %s6021_s28  ;;  %s6676_s1 = sand.u32 1, %s5913_s20  }
  0x33   : > { %p5568_p1 = pneg %p6079_p2  ;;  %s250_s7 = sshll.u32 %s241_s26, 4  ;;  %s251_s7 = int_to_ptr.vmem [resolvable:$true] %s250_s7 }
  0x34   : > { %s238_s24 = scalar_lea.sflag [#allocation3], %s6676_s1  ;;  %s5738_s22 = scalar_lea.vmem %s251_s7, 512 }
  0x35   : > { %s249_s25 = scalar_lea.hbm %s6674_s0, %s6024_s29  ;;  %p6094_p3 = pnand %p5568_p1, %p6656_p5 }
  0x36   : > { %p5739_p6 = scmp.ne.s32.totalorder %s251_s7, %s5738_s22  ;;  %s5932_s15 = smov [#allocation2]  }
  0x37   : > { %s5743_s30 = sshll.u32 %s5932_s15, 4  ;;  %s5744_s30 = int_to_ptr.vmem [resolvable:$false] %s5743_s30 }
  0x38   : > { %p5741_p9 = pnand %p5739_p6, %p6657_p8  ;;  %s5745_s17 = scalar_lea.vmem %s5744_s30, 1024 }
  0x39   : > { %p5746_p0 = scmp.lt.s32.totalorder %s251_s7, %s5744_s30  ;;  %p5747_p4 = scmp.lt.s32.totalorder %s5745_s17, %s5738_s22 }
  0x3a   : > { %p5742_p11 = pneg %p5741_p9 }
  0x3b   : > { %p5748_p13 = por %p5747_p4, %p5746_p0 }
  0x3d   : > { %p5749_p1 = pnand %p5748_p13, %p5742_p11 }
  0x3f   : > { %5752 = shalt.err (!%p5749_p1)
}
  0x40   : > { %s6677_s26 = smov 4   ;;  %s6678_s9 = smov 64  }
  0x41   : > { %s6679_s1 = smov 128   ;;  %p5755_p6 = pneg %p6094_p3 }
  0x42   : > { %5575 = dma.hbm_to_vmem [thread:$0]  (!%p6029_p7), %s249_s25, 512, %s251_s7, %s238_s24, %s6679_s1, %s6678_s9, %s6677_s26  }
  0x43   : > { %s5764_s15 = scalar_lea.vmem %s6083_s16, 1024  ;;  %p5772_p4 = scmp.lt.s32.totalorder %s6083_s16, %s6083_s16 }
  0x44   : > { %p5765_p9 = scmp.ne.s32.totalorder %s6083_s16, %s5764_s15  ;;  %p5773_p13 = scmp.lt.s32.totalorder %s5764_s15, %s5764_s15 }
  0x46   : > { %p5767_p5 = pnand %p5765_p9, %p5755_p6  ;;  %p5774_p11 = por %p5773_p13, %p5772_p4 }
  0x48   : > { %p5768_p8 = pneg %p5767_p5 }
  0x4a   : > { %p5775_p0 = pnand %p5774_p11, %p5768_p8 }
  0x4c   : > { %5778 = shalt.err (!%p5775_p0)
}
  0x4d   : > { %s5933_s22 = smov 8   ;;  %s289_s17 = scalar_lea.hbm %s6643_s2, %s6024_s29 }
  0x4e   : > { %5571 = dma.hbm_to_vmem [thread:$0]  (!%p6094_p3), %s6644_s3, 1024, %s6083_s16, [#allocation9], %s6679_s1, %s6679_s1, %s5933_s22  }
  0x4f   : > { %s284_s15 = scalar_lea.vmem [#allocation7], %s6021_s28  ;;  %p6680_p5 = pneg %p6029_p7 }
  0x50   : > { %s290_s0 = sshll.u32 %s284_s15, 4  ;;  %s5934_s27 = smov [#allocation7]   ;;  %s291_s0 = int_to_ptr.vmem [resolvable:$true] %s290_s0 }
  0x51   : > { %s5792_s20 = scalar_lea.vmem %s291_s0, 512  ;;  %s5797_s23 = sshll.u32 %s5934_s27, 4  ;;  %s5798_s23 = int_to_ptr.vmem [resolvable:$false] %s5797_s23 }
  0x52   : > { %p5793_p8 = scmp.ne.s32.totalorder %s291_s0, %s5792_s20  ;;  %s5799_s30 = scalar_lea.vmem %s5798_s23, 1024 }
  0x53   : > { %p5800_p9 = scmp.lt.s32.totalorder %s291_s0, %s5798_s23  ;;  %p5801_p4 = scmp.lt.s32.totalorder %s5799_s30, %s5792_s20 }
  0x54   : > { %p5795_p1 = pnand %p5793_p8, %p6680_p5 }
  0x55   : > { %p5802_p3 = por %p5801_p4, %p5800_p9 }
  0x56   : > { %p5796_p6 = pneg %p5795_p1 }
  0x58   : > { %p5803_p13 = pnand %p5802_p3, %p5796_p6 }
  0x5a   : > { %5806 = shalt.err (!%p5803_p13)
}
  0x5b   : > { %5581 = dma.hbm_to_vmem [thread:$0]  (!%p6029_p7), %s289_s17, 512, %s291_s0, %s6039_s13, %s6679_s1, %s6678_s9, %s6677_s26  }
  0x5c   : > { %302 = sbr.rel (%p6079_p2) target bundleno = 1864 (0x748), region = 36  ;;  %s6139_s28 = sand.u32 (!%p6079_p2), 1, %s5909_s19  }
  0x5d   : > { %s5342_s20 = sshll.u32 (!%p6079_p2), %s6139_s28, 5  ;;  %s305_s23 = scalar_lea.sflag (!%p6079_p2), [#allocation3], %s6139_s28 }
  0x5e   : > { %s308_s29 = scalar_lea.vmem (!%p6079_p2), [#allocation2], %s5342_s20 }
  0x61   : > { %5884 = dma.done.wait (%p6062_p10), %s305_s23, 512  }
  0x62   : > { %5886 = vsyncadd (%p6062_p10), %s305_s23, 4294966784  ;;  %s313_s0 = sand.u32 1, %s6053_s8   ;;  %s6148_s13 = scalar_lea.vmem [#allocation5], %s5342_s20 }
  0x63   : > { %s314_s6 = scalar_lea.sflag [#allocation6], %s313_s0 }
  0x64   : > { %5888 = dma.done.wait (%p6062_p10), %s314_s6, 1024  }
  0x65   : > { %5890 = vsyncadd (%p6062_p10), %s314_s6, 4294966272  ;;  %s6154_s14 = scalar_lea.vmem [#allocation7], %s5342_s20  ;;  %p6681_p7 = scmp.eq.s32.totalorder %s6053_s8, 0 }
  0x67   : > { %5892 = dma.done.wait (%p6681_p7), [#allocation9], 1024   ;;  %p6682_p2 = pmov %p6681_p7 }
  0x68   : > { %v376_v0 = vld [vmem:[%s308_s29 + $0x8] sm:$0xf]  ;;  %v374_v1 = vld [vmem:[%s308_s29] sm:$0xf]  ;;  %v377_v2 = vld [vmem:[%s308_s29 + $0xc] sm:$0xf]  ;;  %v418_v19 = vlaneseq }
  0x69   : > { %5894 = vsyncadd (%p6682_p2), [#allocation9], 4294966272  ;;  %v6160_v3 = vmul.f32 0.35355338, %v376_v0  ;;  %v6162_v4 = vmul.f32 0.35355338, %v374_v1 }
  0x6a   : > { %v375_v5 = vld [vmem:[%s308_s29 + $0x4] sm:$0xf]  ;;  %v379_v6 = vld [vmem:[%s308_s29 + $0x14] sm:$0xf]  ;;  %v378_v7 = vld [vmem:[%s308_s29 + $0x10] sm:$0xf] }
  0x6b   : > { %546 = vxpose.xlu1.b32.start.end [1/1] (short) (narrow) %v6160_v3, 8  ;;  %482 = vxpose.xlu0.b32.start.end [1/1] (short) (narrow) %v6162_v4, 8  ;;  %v6166_v8 = vmul.f32 0.35355338, %v377_v2  ;;  %v6168_v9 = vmul.f32 0.35355338, %v375_v5 }
  0x6c   : > { %v6170_v10 = vmul.f32 0.35355338, %v379_v6  ;;  %v6172_v11 = vmul.f32 0.35355338, %v378_v7  ;;  %v381_v12 = vld [vmem:[%s308_s29 + $0x1c] sm:$0xf] }
  0x6d   : > { %v380_v13 = vld [vmem:[%s308_s29 + $0x18] sm:$0xf]  ;;  %v6178_v14 = vmul.f32 0.35355338, %v381_v12  ;;  %v5935_v17 = vmov 1983009808  }
  0x6e   : > { %v6180_v15 = vmul.f32 0.35355338, %v380_v13  ;;  %v416_v18 = vunpack.c.l.s4 %v5935_v17  ;;  %v419_v22 = vshrl.u32 %v418_v19, 7  ;;  %v5936_v25 = vmov 1934713408   ;;  %s5346_s8 = sshll.u32 %s6139_s28, 3 }
  0x6f   : > { %578 = vxpose.xlu1.b32.start.end [1/1] (short) (narrow) %v6166_v8, 8  ;;  %514 = vxpose.xlu0.b32.start.end [1/1] (short) (narrow) %v6168_v9, 8  ;;  %v449_v26 = vunpack.c.l.s4 %v5936_v25  ;;  %vm5938_vm0 = vmmov 0   ;;  %v5655_v25 = vld [vmem:[%s6148_s13 + $0x10] ss:$8 sps:$4 sm:$0xff]   ;;  %vm1198_vm1 = vcmask 64512  }
  0x70   : > { %v417_v21 = vunpack.c.0.s8 %v416_v18  ;;  %v5937_v18 = vmov 0.0   ;;  %vm2303_vm2 = vcmask 60416   ;;  %vm5111_vm3 = vcmask 1041409   ;;  %s6411_s11 = scalar_lea.vmem [#allocation11], %s5346_s8  ;;  %s5382_s16 = sshll.u32 %s5917_s21, 7 }
  0x71   : > { %v450_v32 = vunpack.c.0.s8 %v449_v26  ;;  %5434 = vmatprep.subr.mxu0 %v5937_v18  ;;  %5439 = vmatprep.subr.mxu1 %v5937_v18  ;;  %v5656_v26 = vld [vmem:[%s6148_s13 + $0x14] ss:$8 sps:$4 sm:$0xff]   ;;  %vm5113_vm4 = vcmask 1042434   ;;  %vm5115_vm5 = vcmask 1043459   ;;  %vm5117_vm6 = vcmask 1044484   ;;  %s6567_s1 = scalar_lea.hbm %s6646_s5, %s5382_s16  ;;  %s5161_s22 = sshll.u32 %s6411_s11, 4  ;;  %s5162_s22 = int_to_ptr.vmem [resolvable:$true] %s5161_s22 }
  0x72   : > { %v6184_v28 = vsub.s32 %v417_v21, %v419_v22  ;;  %5436 = vmatprep.mubr.msk.f32.mxu0 %vm5938_vm0, %v5937_v18  ;;  %5441 = vmatprep.mubr.msk.f32.mxu1 %vm5938_vm0, %v5937_v18  ;;  %v5653_v21 = vld [vmem:[%s6148_s13] ss:$8 sps:$4 sm:$0xff]   ;;  %vm5119_vm7 = vcmask 1045509   ;;  %vm5121_vm8 = vcmask 1046534   ;;  %vm5123_vm9 = vcmask 1047559   ;;  %s5133_s24 = scalar_lea.sflag [#allocation12], %s6139_s28 }
  0x73   : > { %642 = vxpose.xlu1.b32.start.end [1/1] (short) (narrow) %v6170_v10, 8  ;;  %610 = vxpose.xlu0.b32.start.end [1/1] (short) (narrow) %v6172_v11, 8  ;;  %v6188_v41 = vsub.s32 %v450_v32, %v419_v22  ;;  %s5807_s25 = scalar_lea.vmem %s5162_s22, 128  ;;  %s5939_s7 = smov [#allocation11]  }
  0x74   : > { %v421_v32 = vrot.slane %v5653_v21, %v6184_v28  ;;  %p5808_p10 = scmp.ne.s32.totalorder %s5162_s22, %s5807_s25  ;;  %s5811_s17 = sshll.u32 %s5939_s7, 4  ;;  %s5812_s17 = int_to_ptr.vmem [resolvable:$false] %s5811_s17 }
  0x75   : > { %s5813_s15 = scalar_lea.vmem %s5812_s17, 256  ;;  %p5814_p8 = scmp.lt.s32.totalorder %s5162_s22, %s5812_s17 }
  0x76   : > { %p5809_p11 = pnand %p5808_p10, %p6070_p12  ;;  %p5815_p5 = scmp.lt.s32.totalorder %s5813_s15, %s5807_s25 }
  0x77   : > { %706 = vxpose.xlu1.b32.start.end [1/1] (short) (narrow) %v6178_v14, 8  ;;  %674 = vxpose.xlu0.b32.start.end [1/1] (short) (narrow) %v6180_v15, 8 }
  0x78   : > { %p5810_p0 = pneg %p5809_p11  ;;  %p5816_p1 = por %p5815_p5, %p5814_p8 }
  0x7a   : > { %p5817_p6 = pnand %p5816_p1, %p5810_p0 }
  0xe7   : > { %v562_v16 = vpop.trf.xlu1  ;;  %v498_v20 = vpop.trf.xlu0 }
  0xe8   : > { %v738_v29 = vcombine.low %v498_v20, %v562_v16  ;;  %v739_v46 = vcombine.high %v498_v20, %v562_v16 }
  0xea   : > { %v746_v34 = vrot.slane %v738_v29, %v6184_v28  ;;  %v753_v55 = vrot.slane %v739_v46, %v6184_v28 }
  0xeb   : > { %v594_v23 = vpop.trf.xlu1  ;;  %v530_v24 = vpop.trf.xlu0 }
  0xec   : > { %v754_v27 = vcombine.low %v530_v24, %v594_v23  ;;  %v755_v42 = vcombine.high %v530_v24, %v594_v23  ;;  %v5654_v24 = vld [vmem:[%s6148_s13 + $0x4] ss:$8 sps:$4 sm:$0xff]  }
  0xee   : > { %v762_v33 = vrot.slane %v754_v27, %v6184_v28  ;;  %v769_v51 = vrot.slane %v755_v42, %v6184_v28 }
  0xef   : > { %v658_v30 = vpop.trf.xlu1  ;;  %v626_v31 = vpop.trf.xlu0 }
  0xf0   : > { %v802_v45 = vcombine.low %v746_v34, %v762_v33  ;;  %v803_v54 = vcombine.high %v746_v34, %v762_v33  ;;  %v818_v61 = vcombine.low %v753_v55, %v769_v51  ;;  %v819_v5 = vcombine.high %v753_v55, %v769_v51 }
  0xf1   : > { %v429_v33 = vrot.slane %v5654_v24, %v6184_v28  ;;  %v437_v34 = vrot.slane %v5655_v25, %v6184_v28 }
  0xf2   : > { %v810_v52 = vrot.slane %v802_v45, %v6188_v41  ;;  %v817_v60 = vrot.slane %v803_v54, %v6188_v41  ;;  %v826_v2 = vrot.slane %v818_v61, %v6188_v41  ;;  %v833_v13 = vrot.slane %v819_v5, %v6188_v41 }
  0xf3   : > { %v722_v35 = vpop.trf.xlu1  ;;  %v690_v36 = vpop.trf.xlu0  ;;  %v447_v45 = vcombine.high %v421_v32, %v429_v33 }
  0xf4   : > { %v786_v37 = vcombine.low %v658_v30, %v722_v35  ;;  %v787_v38 = vcombine.high %v658_v30, %v722_v35  ;;  %v770_v39 = vcombine.low %v626_v31, %v690_v36  ;;  %v771_v40 = vcombine.high %v626_v31, %v690_v36 }
  0xf5   : > { %v445_v35 = vrot.slane %v5656_v26, %v6184_v28 }
  0xf6   : > { %v794_v43 = vrot.slane %v786_v37, %v6184_v28  ;;  %v778_v44 = vrot.slane %v770_v39, %v6184_v28  ;;  %v801_v47 = vrot.slane %v787_v38, %v6184_v28  ;;  %v785_v48 = vrot.slane %v771_v40, %v6184_v28 }
  0xf7   : > { %v446_v40 = vcombine.low %v421_v32, %v429_v33  ;;  %v462_v42 = vcombine.low %v437_v34, %v445_v35 }
  0xf8   : > { %v834_v49 = vcombine.low %v778_v44, %v794_v43  ;;  %v835_v50 = vcombine.high %v778_v44, %v794_v43  ;;  %v850_v59 = vcombine.low %v785_v48, %v801_v47  ;;  %v851_v1 = vcombine.high %v785_v48, %v801_v47 }
  0xf9   : > { %v470_v51 = vrot.slane %v462_v42, %v6188_v41 }
  0xfa   : > { %v842_v53 = vrot.slane %v834_v49, %v6188_v41  ;;  %v849_v58 = vrot.slane %v835_v50, %v6188_v41  ;;  %v858_v0 = vrot.slane %v850_v59, %v6188_v41  ;;  %v865_v12 = vrot.slane %v851_v1, %v6188_v41 }
  0xfb   : > { %v463_v49 = vcombine.high %v437_v34, %v445_v35  ;;  %v454_v50 = vrot.slane %v446_v40, %v6188_v41 }
  0xfc   : > { %v867_v56 = vcombine.high %v810_v52, %v842_v53  ;;  %v866_v57 = vcombine.low %v810_v52, %v842_v53  ;;  %v869_v62 = vcombine.high %v817_v60, %v849_v58  ;;  %v868_v63 = vcombine.low %v817_v60, %v849_v58 }
  0xfd   : > { %v871_v6 = vcombine.high %v826_v2, %v858_v0  ;;  %v870_v7 = vcombine.low %v826_v2, %v858_v0  ;;  %v873_v16 = vcombine.high %v833_v13, %v865_v12  ;;  %v872_v17 = vcombine.low %v833_v13, %v865_v12  ;;  %v407_v12 = vld [vmem:[#allocation8 + $0x8] sm:$0xff]  ;;  %v408_v13 = vld [vmem:[#allocation8 + $0x10] sm:$0xff] }
  0xfe   : > { %906 = vxpose.xlu1.b32.start.end [1/1] (short) (narrow) %v867_v56, 8  ;;  %874 = vxpose.xlu0.b32.start.end [1/1] (short) (narrow) %v866_v57, 8  ;;  %v461_v57 = vrot.slane %v447_v45, %v6188_v41  ;;  %v477_v58 = vrot.slane %v463_v49, %v6188_v41  ;;  %v478_v60 = vcombine.low %v454_v50, %v470_v51 }
  0xff   : > { %v479_v61 = vcombine.high %v454_v50, %v470_v51 }
 0x100   : > { %v480_v1 = vcombine.low %v461_v57, %v477_v58 }
 0x102   : > { %970 = vxpose.xlu1.b32.start.end [1/1] (short) (narrow) %v869_v62, 8  ;;  %938 = vxpose.xlu0.b32.start.end [1/1] (short) (narrow) %v868_v63, 8 }
 0x106   : > { %1034 = vxpose.xlu1.b32.start.end [1/1] (short) (narrow) %v871_v6, 8  ;;  %1002 = vxpose.xlu0.b32.start.end [1/1] (short) (narrow) %v870_v7, 8  ;;  %v481_v6 = vcombine.high %v461_v57, %v477_v58  ;;  %v406_v7 = vld [vmem:[#allocation8] sm:$0xff] }
 0x10a   : > { %1098 = vxpose.xlu1.b32.start.end [1/1] (short) (narrow) %v873_v16, 8  ;;  %1066 = vxpose.xlu0.b32.start.end [1/1] (short) (narrow) %v872_v17, 8  ;;  %v409_v16 = vld [vmem:[#allocation8 + $0x18] sm:$0xff]  ;;  %v410_v17 = vld [vmem:[#allocation8 + $0x20] sm:$0xff] }
 0x17a   : > { %v922_v19 = vpop.trf.xlu1  ;;  %v890_v20 = vpop.trf.xlu0 }
 0x17e   : > { %v986_v22 = vpop.trf.xlu1  ;;  %v954_v23 = vpop.trf.xlu0 }
 0x17f   : > { %v1138_v27 = vcombine.low %v922_v19, %v986_v22  ;;  %v1130_v29 = vcombine.low %v890_v20, %v954_v23  ;;  %v411_v19 = vld [vmem:[#allocation8 + $0x28] sm:$0xff] }
 0x181   : > { %v1145_v36 = vrot.slane %v1138_v27, %v6184_v28  ;;  %v1137_v37 = vrot.slane %v1130_v29, %v6184_v28 }
 0x182   : > { %v1050_v30 = vpop.trf.xlu1  ;;  %v1018_v31 = vpop.trf.xlu0 }
 0x183   : > { %v1162_v46 = vcombine.low %v1137_v37, %v1145_v36  ;;  %v1163_v54 = vcombine.high %v1137_v37, %v1145_v36 }
 0x185   : > { %v1170_v55 = vrot.slane %v1162_v46, %v6188_v41  ;;  %v1177_v0 = vrot.slane %v1163_v54, %v6188_v41 }
 0x186   : > { %v1114_v38 = vpop.trf.xlu1  ;;  %v1082_v39 = vpop.trf.xlu0 }
 0x187   : > { %v1154_v43 = vcombine.low %v1050_v30, %v1114_v38  ;;  %v1146_v44 = vcombine.low %v1018_v31, %v1082_v39 }
 0x189   : > { %v1161_v47 = vrot.slane %v1154_v43, %v6184_v28  ;;  %v1153_v48 = vrot.slane %v1146_v44, %v6184_v28 }
 0x18b   : > { %v1178_v52 = vcombine.low %v1153_v48, %v1161_v47  ;;  %v1179_v53 = vcombine.high %v1153_v48, %v1161_v47 }
 0x18d   : > { %v1186_v56 = vrot.slane %v1178_v52, %v6188_v41  ;;  %v1193_v59 = vrot.slane %v1179_v53, %v6188_v41 }
 0x18f   : > { %v1194_v62 = vcombine.low %v1170_v55, %v1186_v56  ;;  %v1195_v63 = vcombine.high %v1170_v55, %v1186_v56  ;;  %v1196_v2 = vcombine.low %v1177_v0, %v1193_v59  ;;  %v1197_v5 = vcombine.high %v1177_v0, %v1193_v59 }
 0x191   : > { %5435 = vmatpush3.msra.mxu0 %v1194_v62  ;;  %5440 = vmatpush3.msra.mxu1 %v1195_v63 }
 0x192   : > { %5437 = vmatmul.mubr.msk.f32.vlgmr.msra.gmra.mxu0 %vm1198_vm1, %v478_v60  ;;  %5442 = vmatmul.mubr.msk.f32.vlgmr.msra.gmra.mxu1 %vm1198_vm1, %v479_v61 }
 0x193   : > { %5444 = vmatprep.subr.mxu0 %v5937_v18  ;;  %5449 = vmatprep.subr.mxu1 %v5937_v18 }
 0x194   : > { %5445 = vmatpush3.msra.mxu0 %v1196_v2  ;;  %5450 = vmatpush3.msra.mxu1 %v1197_v5 }
 0x195   : > { %5446 = vmatprep.mubr.msk.f32.mxu0 %vm5938_vm0, %v5937_v18  ;;  %5451 = vmatprep.mubr.msk.f32.mxu1 %vm5938_vm0, %v5937_v18 }
 0x196   : > { %5447 = vmatmul.mubr.msk.f32.vlgmr.msra.gmra.mxu0 %vm1198_vm1, %v480_v1  ;;  %5452 = vmatmul.mubr.msk.f32.vlgmr.msra.gmra.mxu1 %vm1198_vm1, %v481_v6 }
 0x197   : > { %5454 = vmatprep.subr.mxu0 %v5937_v18  ;;  %5459 = vmatprep.subr.mxu1 %v5937_v18 }
 0x198   : > { %5455 = vmatpush3.xpose.msk.msra.mxu0 %vm1198_vm1, %v406_v7  ;;  %5456 = vmatprep.mubr.msk.f32.mxu0 %vm5938_vm0, %v5937_v18 }
 0x199   : > { %5460 = vmatpush3.xpose.msk.msra.mxu1 %vm1198_vm1, %v407_v12  ;;  %5464 = vmatprep.subr.mxu0 %v5937_v18 }
 0x19a   : > { %5461 = vmatprep.mubr.msk.f32.mxu1 %vm5938_vm0, %v5937_v18  ;;  %5469 = vmatprep.subr.mxu1 %v5937_v18 }
 0x19b   : > { %5457 = vmatmul.mubr.msk.f32.vlgmr.msra.gmra.mxu0 %vm1198_vm1, %v6162_v4  ;;  %v412_v4 = vld [vmem:[#allocation8 + $0x30] sm:$0xff] }
 0x19c   : > { %5465 = vmatpush3.xpose.msk.msra.mxu0 %vm1198_vm1, %v408_v13  ;;  %5462 = vmatmul.mubr.msk.f32.vlgmr.msra.gmra.mxu1 %vm1198_vm1, %v6168_v9  ;;  %v413_v9 = vld [vmem:[#allocation8 + $0x38] sm:$0xff] }
 0x19d   : > { %5466 = vmatprep.mubr.msk.f32.mxu0 %vm5938_vm0, %v5937_v18  ;;  %5470 = vmatpush3.xpose.msk.msra.mxu1 %vm1198_vm1, %v409_v16 }
 0x19e   : > { %5474 = vmatprep.subr.mxu0 %v5937_v18  ;;  %5471 = vmatprep.mubr.msk.f32.mxu1 %vm5938_vm0, %v5937_v18 }
 0x19f   : > { %5467 = vmatmul.mubr.msk.f32.vlgmr.msra.gmra.mxu0 %vm1198_vm1, %v6160_v3  ;;  %5479 = vmatprep.subr.mxu1 %v5937_v18 }
 0x1a0   : > { %5475 = vmatpush3.xpose.msk.msra.mxu0 %vm1198_vm1, %v410_v17  ;;  %5472 = vmatmul.mubr.msk.f32.vlgmr.msra.gmra.mxu1 %vm1198_vm1, %v6166_v8 }
 0x1a1   : > { %5476 = vmatprep.mubr.msk.f32.mxu0 %vm5938_vm0, %v5937_v18  ;;  %5480 = vmatpush3.xpose.msk.msra.mxu1 %vm1198_vm1, %v411_v19 }
 0x1a2   : > { %5484 = vmatprep.subr.mxu0 %v5937_v18  ;;  %5481 = vmatprep.mubr.msk.f32.mxu1 %vm5938_vm0, %v5937_v18 }
 0x1a3   : > { %5477 = vmatmul.mubr.msk.f32.vlgmr.msra.gmra.mxu0 %vm1198_vm1, %v6172_v11  ;;  %5489 = vmatprep.subr.mxu1 %v5937_v18 }
 0x1a4   : > { %5485 = vmatpush3.xpose.msk.msra.mxu0 %vm1198_vm1, %v412_v4  ;;  %5482 = vmatmul.mubr.msk.f32.vlgmr.msra.gmra.mxu1 %vm1198_vm1, %v6170_v10 }
 0x1a5   : > { %5486 = vmatprep.mubr.msk.f32.mxu0 %vm5938_vm0, %v5937_v18  ;;  %5490 = vmatpush3.xpose.msk.msra.mxu1 %vm1198_vm1, %v413_v9 }
 0x1a6   : > { %5491 = vmatprep.mubr.msk.f32.mxu1 %vm5938_vm0, %v5937_v18  ;;  %5494 = vmatprep.subr.mxu0 %v5937_v18 }
 0x1a7   : > { %5487 = vmatmul.mubr.msk.f32.vlgmr.msra.gmra.mxu0 %vm1198_vm1, %v6180_v15  ;;  %5499 = vmatprep.subr.mxu1 %v5937_v18 }
 0x1a8   : > { %5492 = vmatmul.mubr.msk.f32.vlgmr.msra.gmra.mxu1 %vm1198_vm1, %v6178_v14  ;;  %5496 = vmatprep.mubr.msk.f32.mxu0 %vm5938_vm0, %v5937_v18 }
 0x1a9   : > { %5501 = vmatprep.mubr.msk.f32.mxu1 %vm5938_vm0, %v5937_v18 }
 0x252   : > { %v1268_v3 = vpop.f32.mrf.mxu0  ;;  %v1341_v8 = vpop.f32.mrf.mxu1 }
 0x253   : > { %1523 = vxpose.xlu1.b32.start.end [1/1] (short) (narrow) %v1341_v8, 8  ;;  %1491 = vxpose.xlu0.b32.start.end [1/1] (short) (narrow) %v1268_v3, 8 }
 0x254   : > { %v5438_v10 = vpop.f32.mrf.mxu0  ;;  %v5443_v11 = vpop.f32.mrf.mxu1 }
 0x256   : > { %v1414_v20 = vpop.f32.mrf.mxu0  ;;  %v1487_v21 = vpop.f32.mrf.mxu1 }
 0x257   : > { %1587 = vxpose.xlu1.b32.start.end [1/1] (short) (narrow) %v1487_v21, 8  ;;  %1555 = vxpose.xlu0.b32.start.end [1/1] (short) (narrow) %v1414_v20, 8 }
 0x258   : > { %v5448_v15 = vpop.f32.mrf.mxu0  ;;  %v5453_v22 = vpop.f32.mrf.mxu1 }
 0x25b   : > { %v1759_v23 = vpop.f32.mrf.mxu0 }
 0x25c   : > { %v1835_v14 = vpop.f32.mrf.mxu1 }
 0x25d   : > { %v5458_v24 = vpop.f32.mrf.mxu0 }
 0x25e   : > { %v5463_v25 = vpop.f32.mrf.mxu1 }
 0x25f   : > { %v1911_v26 = vpop.f32.mrf.mxu0 }
 0x260   : > { %v1987_v27 = vpop.f32.mrf.mxu1 }
 0x261   : > { %v5468_v29 = vpop.f32.mrf.mxu0 }
 0x262   : > { %v5473_v30 = vpop.f32.mrf.mxu1 }
 0x263   : > { %v2063_v31 = vpop.f32.mrf.mxu0 }
 0x264   : > { %v2139_v32 = vpop.f32.mrf.mxu1 }
 0x265   : > { %v5478_v33 = vpop.f32.mrf.mxu0 }
 0x266   : > { %v5483_v34 = vpop.f32.mrf.mxu1 }
 0x267   : > { %v2215_v35 = vpop.f32.mrf.mxu0 }
 0x268   : > { %v2291_v36 = vpop.f32.mrf.mxu1 }
 0x269   : > { %v5488_v37 = vpop.f32.mrf.mxu0 }
 0x26a   : > { %v5493_v38 = vpop.f32.mrf.mxu1 }
 0x2cf   : > { %v1539_v39 = vpop.trf.xlu1  ;;  %v1507_v40 = vpop.trf.xlu0 }
 0x2d3   : > { %v1603_v42 = vpop.trf.xlu1  ;;  %v1571_v43 = vpop.trf.xlu0 }
 0x2d4   : > { %v1635_v44 = vcombine.low %v1539_v39, %v1603_v42  ;;  %v1636_v45 = vcombine.high %v1539_v39, %v1603_v42  ;;  %v1619_v46 = vcombine.low %v1507_v40, %v1571_v43  ;;  %v1620_v47 = vcombine.high %v1507_v40, %v1571_v43 }
 0x2d6   : > { %v1643_v48 = vrot.slane %v1635_v44, %v6184_v28  ;;  %v1650_v49 = vrot.slane %v1636_v45, %v6184_v28  ;;  %v1627_v50 = vrot.slane %v1619_v46, %v6184_v28  ;;  %v1634_v51 = vrot.slane %v1620_v47, %v6184_v28 }
 0x2d8   : > { %v1651_v52 = vcombine.low %v1627_v50, %v1643_v48  ;;  %v1652_v53 = vcombine.high %v1627_v50, %v1643_v48  ;;  %v1667_v54 = vcombine.low %v1634_v51, %v1650_v49  ;;  %v1668_v58 = vcombine.high %v1634_v51, %v1650_v49 }
 0x2da   : > { %v1666_v55 = vrot.slane %v1652_v53, %v6188_v41  ;;  %v1659_v56 = vrot.slane %v1651_v52, %v6188_v41  ;;  %v1675_v57 = vrot.slane %v1667_v54, %v6188_v41  ;;  %v1682_v1 = vrot.slane %v1668_v58, %v6188_v41 }
 0x2dc   : > { %v2297_v59 = vadd.f32 %v1911_v26, %v1666_v55  ;;  %v2295_v60 = vadd.f32 %v1759_v23, %v1659_v56  ;;  %v1683_v61 = vcombine.high %v1659_v56, %v5937_v18  ;;  %v1684_v62 = vcombine.high %v1666_v55, %v5937_v18 }
 0x2dd   : > { %v2299_v0 = vadd.f32 %v2063_v31, %v1675_v57  ;;  %v1685_v7 = vcombine.high %v1675_v57, %v5937_v18  ;;  %v2301_v13 = vadd.f32 %v2215_v35, %v1682_v1  ;;  %v1686_v19 = vcombine.high %v1682_v1, %v5937_v18 }
 0x2de   : > { %v2310_v63 = vsel %vm2303_vm2, %v2297_v59, -inf  ;;  %v2304_v2 = vsel %vm2303_vm2, %v2295_v60, -inf  ;;  %v2296_v5 = vadd.f32 %v1835_v14, %v1683_v61  ;;  %v2298_v6 = vadd.f32 %v1987_v27, %v1684_v62  ;;  %v402_v61 = vld [vmem:[%s6154_s14 + $0x10] sm:$0xf]  ;;  %v399_v62 = vld [vmem:[%s6154_s14 + $0x4] sm:$0xf] }
 0x2df   : > { %2311 = vmax.xlane.f32.xlu1 %v2310_v63  ;;  %2305 = vmax.xlane.f32.xlu0 %v2304_v2  ;;  %v2316_v16 = vsel %vm2303_vm2, %v2299_v0, -inf  ;;  %v2300_v17 = vadd.f32 %v2139_v32, %v1685_v7  ;;  %v2322_v9 = vsel %vm2303_vm2, %v2301_v13, -inf  ;;  %v2302_v3 = vadd.f32 %v2291_v36, %v1686_v19  ;;  %v401_v63 = vld [vmem:[%s6154_s14 + $0xc] sm:$0xf] }
 0x2e0   : > { %v2307_v12 = vsel %vm2303_vm2, %v2296_v5, -inf  ;;  %v2313_v4 = vsel %vm2303_vm2, %v2298_v6, -inf }
 0x2e1   : > { %v2319_v8 = vsel %vm2303_vm2, %v2300_v17, -inf  ;;  %v2325_v10 = vsel %vm2303_vm2, %v2302_v3, -inf }
 0x2e3   : > { %2308 = vmax.xlane.f32.xlu1 %v2307_v12  ;;  %2317 = vmax.xlane.f32.xlu0 %v2316_v16 }
 0x2e7   : > { %2314 = vmax.xlane.f32.xlu1 %v2313_v4  ;;  %2323 = vmax.xlane.f32.xlu0 %v2322_v9 }
 0x2eb   : > { %2320 = vmax.xlane.f32.xlu1 %v2319_v8 }
 0x2ef   : > { %2326 = vmax.xlane.f32.xlu1 %v2325_v10 }
 0x368   : > { %v2312_v11 = vpop.xlane.xlu1 %2311  ;;  %v2306_v20 = vpop.xlane.xlu0 %2305 }
 0x369   : > { %v2330_v21 = vsub.f32 %v2297_v59, %v2312_v11  ;;  %v2328_v15 = vsub.f32 %v2295_v60, %v2306_v20  ;;  %v398_v59 = vld [vmem:[%s6154_s14] sm:$0xf]  ;;  %v400_v60 = vld [vmem:[%s6154_s14 + $0x8] sm:$0xf] }
 0x36b   : > { %v2336_v22 = vmul.f32 1.442695, %v2328_v15  ;;  %v2340_v23 = vmul.f32 1.442695, %v2330_v21 }
 0x36c   : > { %v2309_v14 = vpop.xlane.xlu1 %2308  ;;  %v2318_v25 = vpop.xlane.xlu0 %2317 }
 0x36d   : > { %v2329_v24 = vsub.f32 %v2296_v5, %v2309_v14  ;;  %5657 = vpow2.f32 %v2336_v22  ;;  %v2332_v26 = vsub.f32 %v2299_v0, %v2318_v25  ;;  %v403_v0 = vld [vmem:[%s6154_s14 + $0x14] sm:$0xf] }
 0x36e   : > { %5659 = vpow2.f32 %v2340_v23 }
 0x36f   : > { %v2338_v27 = vmul.f32 1.442695, %v2329_v24  ;;  %v2344_v29 = vmul.f32 1.442695, %v2332_v26 }
 0x370   : > { %v2315_v30 = vpop.xlane.xlu1 %2314  ;;  %v2324_v32 = vpop.xlane.xlu0 %2323 }
 0x371   : > { %5661 = vpow2.f32 %v2338_v27  ;;  %v2331_v31 = vsub.f32 %v2298_v6, %v2315_v30  ;;  %v2334_v33 = vsub.f32 %v2301_v13, %v2324_v32 }
 0x372   : > { %5663 = vpow2.f32 %v2344_v29 }
 0x373   : > { %v2342_v34 = vmul.f32 1.442695, %v2331_v31  ;;  %v2348_v35 = vmul.f32 1.442695, %v2334_v33 }
 0x374   : > { %v2321_v36 = vpop.xlane.xlu1 %2320 }
 0x375   : > { %5665 = vpow2.f32 %v2342_v34  ;;  %v2333_v37 = vsub.f32 %v2300_v17, %v2321_v36 }
 0x376   : > { %5667 = vpow2.f32 %v2348_v35 }
 0x377   : > { %v2346_v38 = vmul.f32 1.442695, %v2333_v37 }
 0x378   : > { %v2327_v39 = vpop.xlane.xlu1 %2326 }
 0x379   : > { %5669 = vpow2.f32 %v2346_v38  ;;  %v2335_v40 = vsub.f32 %v2302_v3, %v2327_v39 }
 0x37a   : > { %v6314_v42 = vpop.eup %5657 }
 0x37b   : > { %v2350_v43 = vmul.f32 1.442695, %v2335_v40  ;;  %v2352_v44 = vsel %vm2303_vm2, %v6314_v42, 0.0  ;;  %v6318_v45 = vpop.eup %5659 }
 0x37c   : > { %2353 = vadd.xlane.f32.xlu0 %v2352_v44  ;;  %v2358_v48 = vsel %vm2303_vm2, %v6318_v45, 0.0 }
 0x37d   : > { %5671 = vpow2.f32 %v2350_v43 }
 0x37e   : > { %v6320_v46 = vpop.eup %5661 }
 0x37f   : > { %v2355_v47 = vsel %vm2303_vm2, %v6320_v46, 0.0  ;;  %v6326_v49 = vpop.eup %5663 }
 0x380   : > { %2356 = vadd.xlane.f32.xlu1 %v2355_v47  ;;  %2359 = vadd.xlane.f32.xlu0 %v2358_v48  ;;  %v2364_v52 = vsel %vm2303_vm2, %v6326_v49, 0.0 }
 0x382   : > { %v6328_v50 = vpop.eup %5665 }
 0x383   : > { %v2361_v51 = vsel %vm2303_vm2, %v6328_v50, 0.0  ;;  %v6334_v53 = vpop.eup %5667 }
 0x384   : > { %2362 = vadd.xlane.f32.xlu1 %v2361_v51  ;;  %2365 = vadd.xlane.f32.xlu0 %v2364_v52  ;;  %v2370_v56 = vsel %vm2303_vm2, %v6334_v53, 0.0 }
 0x386   : > { %v6336_v54 = vpop.eup %5669 }
 0x387   : > { %v2367_v55 = vsel %vm2303_vm2, %v6336_v54, 0.0 }
 0x388   : > { %2368 = vadd.xlane.f32.xlu1 %v2367_v55  ;;  %2371 = vadd.xlane.f32.xlu0 %v2370_v56 }
 0x38a   : > { %v6342_v57 = vpop.eup %5671 }
 0x38b   : > { %v2373_v58 = vsel %vm2303_vm2, %v6342_v57, 0.0 }
 0x38c   : > { %2374 = vadd.xlane.f32.xlu1 %v2373_v58 }
 0x3b5   : > { %2440 = vxpose.xlu0.b32.start.end [1/1] (short) (narrow) %v398_v59, 8 }
 0x3b9   : > { %2504 = vxpose.xlu0.b32.start.end [1/1] (short) (narrow) %v400_v60, 8 }
 0x3bd   : > { %2568 = vxpose.xlu0.b32.start.end [1/1] (short) (narrow) %v402_v61, 8 }
 0x3bf   : > { %2472 = vxpose.xlu1.b32.start.end [1/1] (short) (narrow) %v399_v62, 8 }
 0x3c3   : > { %2536 = vxpose.xlu1.b32.start.end [1/1] (short) (narrow) %v401_v63, 8 }
 0x3c7   : > { %2600 = vxpose.xlu1.b32.start.end [1/1] (short) (narrow) %v403_v0, 8 }
 0x405   : > { %v2354_v1 = vpop.xlane.xlu0 %2353 }
 0x406   : > { %5673 = vrcp.f32 %v2354_v1 }
 0x409   : > { %v2357_v2 = vpop.xlane.xlu1 %2356  ;;  %v2360_v5 = vpop.xlane.xlu0 %2359 }
 0x40a   : > { %5675 = vrcp.f32 %v2357_v2 }
 0x40b   : > { %5677 = vrcp.f32 %v2360_v5 }
 0x40d   : > { %v2363_v6 = vpop.xlane.xlu1 %2362  ;;  %v2366_v7 = vpop.xlane.xlu0 %2365 }
 0x40e   : > { %5679 = vrcp.f32 %v2363_v6 }
 0x40f   : > { %5681 = vrcp.f32 %v2366_v7 }
 0x411   : > { %v2369_v12 = vpop.xlane.xlu1 %2368  ;;  %v2372_v13 = vpop.xlane.xlu0 %2371 }
 0x412   : > { %5683 = vrcp.f32 %v2369_v12 }
 0x413   : > { %5685 = vrcp.f32 %v2372_v13  ;;  %v5674_v16 = vpop.eup %5673 }
 0x414   : > { %v2384_v17 = vmul.f32 %v5674_v16, %v2354_v1 }
 0x415   : > { %v6352_v19 = vpop.xlane.xlu1 %2374 }
 0x416   : > { %5687 = vrcp.f32 %v6352_v19  ;;  %v2392_v9 = vsub.f32 2.0, %v2384_v17 }
 0x417   : > { %v5676_v4 = vpop.eup %5675 }
 0x418   : > { %v5678_v3 = vpop.eup %5677  ;;  %v2385_v8 = vmul.f32 %v5676_v4, %v2357_v2  ;;  %v2400_v10 = vmul.f32 %v5674_v16, %v2392_v9 }
 0x419   : > { %v2386_v11 = vmul.f32 %v5678_v3, %v2360_v5 }
 0x41a   : > { %v2393_v20 = vsub.f32 2.0, %v2385_v8  ;;  %v2408_v15 = vmul.f32 %v2400_v10, %v2354_v1 }
 0x41b   : > { %v5680_v21 = vpop.eup %5679  ;;  %v2394_v22 = vsub.f32 2.0, %v2386_v11 }
 0x41c   : > { %v5682_v23 = vpop.eup %5681  ;;  %v2401_v14 = vmul.f32 %v5676_v4, %v2393_v20  ;;  %v2387_v24 = vmul.f32 %v5680_v21, %v2363_v6  ;;  %v2416_v25 = vsub.f32 2.0, %v2408_v15 }
 0x41d   : > { %v2402_v26 = vmul.f32 %v5678_v3, %v2394_v22  ;;  %v2388_v27 = vmul.f32 %v5682_v23, %v2366_v7 }
 0x41e   : > { %v2409_v29 = vmul.f32 %v2401_v14, %v2357_v2  ;;  %v2395_v30 = vsub.f32 2.0, %v2387_v24  ;;  %v2424_v34 = vmul.f32 %v2416_v25, %v2400_v10 }
 0x41f   : > { %v5684_v31 = vpop.eup %5683  ;;  %v2410_v32 = vmul.f32 %v2402_v26, %v2360_v5  ;;  %v2396_v33 = vsub.f32 2.0, %v2388_v27 }
 0x420   : > { %v5686_v35 = vpop.eup %5685  ;;  %v2417_v36 = vsub.f32 2.0, %v2409_v29  ;;  %v2403_v37 = vmul.f32 %v5680_v21, %v2395_v30  ;;  %v2389_v38 = vmul.f32 %v5684_v31, %v2369_v12  ;;  %v6356_v44 = vmul.f32 %v6314_v42, %v2424_v34 }
 0x421   : > { %v2418_v39 = vsub.f32 2.0, %v2410_v32  ;;  %v2404_v40 = vmul.f32 %v5682_v23, %v2396_v33  ;;  %v2390_v43 = vmul.f32 %v5686_v35, %v2372_v13 }
 0x422   : > { %v2411_v47 = vmul.f32 %v2403_v37, %v2363_v6  ;;  %v2397_v48 = vsub.f32 2.0, %v2389_v38  ;;  %v2425_v51 = vmul.f32 %v2417_v36, %v2401_v14  ;;  %3156 = vxpose.xlu0.b32.start.end [1/1] (short) (narrow) %v6356_v44, 8  ;;  %v5039_v58 = vsel %vm2303_vm2, %v6356_v44, 0.0 }
 0x423   : > { %v5688_v52 = vpop.eup %5687  ;;  %v2412_v55 = vmul.f32 %v2404_v40, %v2366_v7  ;;  %v2398_v56 = vsub.f32 2.0, %v2390_v43  ;;  %v2426_v59 = vmul.f32 %v2418_v39, %v2402_v26  ;;  %v5040_v63 = vrot.slane %v5039_v58, 4 }
 0x424   : > { %v2419_v60 = vsub.f32 2.0, %v2411_v47  ;;  %v2405_v61 = vmul.f32 %v5684_v31, %v2397_v48  ;;  %v2391_v62 = vmul.f32 %v5688_v52, %v6352_v19  ;;  %v6363_v1 = vmul.f32 %v6320_v46, %v2425_v51 }
 0x425   : > { %v2420_v0 = vsub.f32 2.0, %v2412_v55  ;;  %v2406_v42 = vmul.f32 %v5686_v35, %v2398_v56  ;;  %v6366_v2 = vmul.f32 %v6318_v45, %v2426_v59  ;;  %v5041_v7 = vadd.f32 %v5040_v63, %v5039_v58  ;;  %v405_v63 = vld [vmem:[%s6154_s14 + $0x1c] sm:$0xf] }
 0x426   : > { %v2413_v5 = vmul.f32 %v2405_v61, %v2369_v12  ;;  %v2399_v6 = vsub.f32 2.0, %v2391_v62  ;;  %v2427_v16 = vmul.f32 %v2419_v60, %v2403_v37  ;;  %3188 = vxpose.xlu1.b32.start.end [1/1] (short) (narrow) %v6363_v1, 8  ;;  %v5046_v4 = vsel %vm2303_vm2, %v6363_v1, 0.0 }
 0x427   : > { %v2414_v17 = vmul.f32 %v2406_v42, %v2372_v13  ;;  %3220 = vxpose.xlu0.b32.start.end [1/1] (short) (narrow) %v6366_v2, 8  ;;  %v5053_v9 = vsel %vm2303_vm2, %v6366_v2, 0.0  ;;  %v2428_v46 = vmul.f32 %v2420_v0, %v2404_v40  ;;  %v5042_v45 = vrot.slane %v5041_v7, 2 }
 0x428   : > { %v2421_v3 = vsub.f32 2.0, %v2413_v5  ;;  %v2407_v8 = vmul.f32 %v5688_v52, %v2399_v6  ;;  %v5047_v10 = vrot.slane %v5046_v4, 4  ;;  %v5054_v11 = vrot.slane %v5053_v9, 4  ;;  %v404_v6 = vld [vmem:[%s6154_s14 + $0x18] sm:$0xf] }
 0x429   : > { %v2422_v12 = vsub.f32 2.0, %v2414_v17  ;;  %v6375_v20 = vmul.f32 %v6326_v49, %v2428_v46  ;;  %v6378_v13 = vmul.f32 %v6328_v50, %v2427_v16  ;;  %v5043_v15 = vadd.f32 %v5042_v45, %v5041_v7 }
 0x42a   : > { %v2415_v21 = vmul.f32 %v2407_v8, %v6352_v19  ;;  %v5048_v22 = vadd.f32 %v5047_v10, %v5046_v4  ;;  %v2429_v23 = vmul.f32 %v2421_v3, %v2405_v61  ;;  %v5055_v14 = vadd.f32 %v5054_v11, %v5053_v9 }
 0x42b   : > { %3284 = vxpose.xlu0.b32.start.end [1/1] (short) (narrow) %v6375_v20, 8  ;;  %v5067_v24 = vsel %vm2303_vm2, %v6375_v20, 0.0  ;;  %v2430_v25 = vmul.f32 %v2422_v12, %v2406_v42  ;;  %v5060_v26 = vsel %vm2303_vm2, %v6378_v13, 0.0  ;;  %v5044_v27 = vrot.slane %v5043_v15, 1 }
 0x42c   : > { %v2423_v49 = vsub.f32 2.0, %v2415_v21  ;;  %v5049_v29 = vrot.slane %v5048_v22, 2  ;;  %v5068_v50 = vrot.slane %v5067_v24, 4  ;;  %v5056_v30 = vrot.slane %v5055_v14, 2 }
 0x42d   : > { %v6387_v19 = vmul.f32 %v6336_v54, %v2429_v23  ;;  %v6390_v31 = vmul.f32 %v6334_v53, %v2430_v25  ;;  %v5061_v32 = vrot.slane %v5060_v26, 4  ;;  %v5045_v39 = vadd.f32 %v5044_v27, %v5043_v15 }
 0x42e   : > { %v5050_v33 = vadd.f32 %v5049_v29, %v5048_v22  ;;  %v5069_v34 = vadd.f32 %v5068_v50, %v5067_v24  ;;  %v2431_v35 = vmul.f32 %v2423_v49, %v2407_v8  ;;  %v5057_v36 = vadd.f32 %v5056_v30, %v5055_v14 }
 0x42f   : > { %3316 = vxpose.xlu1.b32.start.end [1/1] (short) (narrow) %v6387_v19, 8  ;;  %v5074_v37 = vsel %vm2303_vm2, %v6387_v19, 0.0  ;;  %3348 = vxpose.xlu0.b32.start.end [1/1] (short) (narrow) %v6390_v31, 8  ;;  %v5081_v38 = vsel %vm2303_vm2, %v6390_v31, 0.0  ;;  %v5062_v54 = vadd.f32 %v5061_v32, %v5060_v26  ;;  %v5095_v7 = vmul.f32 0.25, %v5045_v39 }
 0x430   : > { %v5051_v40 = vrot.slane %v5050_v33, 1  ;;  %v5070_v53 = vrot.slane %v5069_v34, 2  ;;  %v5075_v43 = vrot.slane %v5074_v37, 4  ;;  %v5058_v47 = vrot.slane %v5057_v36, 1 }
 0x431   : > { %v5082_v48 = vrot.slane %v5081_v38, 4  ;;  %v6399_v51 = vmul.f32 %v6342_v57, %v2431_v35  ;;  %v5063_v52 = vrot.slane %v5062_v54, 2 }
 0x432   : > { %v5052_v55 = vadd.f32 %v5051_v40, %v5050_v33  ;;  %v5071_v56 = vadd.f32 %v5070_v53, %v5069_v34  ;;  %v5076_v58 = vadd.f32 %v5075_v43, %v5074_v37  ;;  %v5059_v59 = vadd.f32 %v5058_v47, %v5057_v36  ;;  %v2456_v36 = vpop.trf.xlu0 }
 0x433   : > { %v5083_v60 = vadd.f32 %v5082_v48, %v5081_v38  ;;  %3380 = vxpose.xlu1.b32.start.end [1/1] (short) (narrow) %v6399_v51, 8  ;;  %v5088_v61 = vsel %vm2303_vm2, %v6399_v51, 0.0  ;;  %v5064_v62 = vadd.f32 %v5063_v52, %v5062_v54  ;;  %3252 = vxpose.xlu0.b32.start.end [1/1] (short) (narrow) %v6378_v13, 8 }
 0x434   : > { %v5096_v0 = vmul.f32 0.25, %v5052_v55  ;;  %v5072_v57 = vrot.slane %v5071_v56, 1  ;;  %v5077_v42 = vrot.slane %v5076_v58, 2  ;;  %v5089_v5 = vrot.slane %v5088_v61, 4 }
 0x435   : > { %v5084_v16 = vrot.slane %v5083_v60, 2  ;;  %v5065_v17 = vrot.slane %v5064_v62, 1  ;;  %v5097_v4 = vmul.f32 0.25, %v5059_v59 }
 0x436   : > { %v5073_v9 = vadd.f32 %v5072_v57, %v5071_v56  ;;  %v5078_v46 = vadd.f32 %v5077_v42, %v5076_v58  ;;  %v5090_v3 = vadd.f32 %v5089_v5, %v5088_v61  ;;  %v5112_v8 = vsel %vm5111_vm3, %v5096_v0, %v5095_v7  ;;  %v2520_v38 = vpop.trf.xlu0 }
 0x437   : > { %v5085_v45 = vadd.f32 %v5084_v16, %v5083_v60  ;;  %v5066_v10 = vadd.f32 %v5065_v17, %v5064_v62  ;;  %2664 = vxpose.xlu1.b32.start.end [1/1] (short) (narrow) %v405_v63, 8  ;;  %2632 = vxpose.xlu0.b32.start.end [1/1] (short) (narrow) %v404_v6, 8  ;;  %v5114_v23 = vsel %vm5113_vm4, %v5097_v4, %v5112_v8 }
 0x438   : > { %v5079_v12 = vrot.slane %v5078_v46, 1  ;;  %v5091_v11 = vrot.slane %v5090_v3, 2  ;;  %v5099_v21 = vmul.f32 0.25, %v5073_v9  ;;  %v2696_v58 = vcombine.low %v2456_v36, %v2520_v38 }
 0x439   : > { %v5086_v15 = vrot.slane %v5085_v45, 1  ;;  %v5098_v22 = vmul.f32 0.25, %v5066_v10  ;;  %v2697_v16 = vcombine.high %v2456_v36, %v2520_v38 }
 0x43a   : > { %v5080_v14 = vadd.f32 %v5079_v12, %v5078_v46  ;;  %v5092_v24 = vadd.f32 %v5091_v11, %v5090_v3  ;;  %v2584_v54 = vpop.trf.xlu0  ;;  %v2704_v62 = vrot.slane %v2696_v58, %v6184_v28 }
 0x43b   : > { %v5087_v25 = vadd.f32 %v5086_v15, %v5085_v45  ;;  %v5116_v26 = vsel %vm5115_vm5, %v5098_v22, %v5114_v23  ;;  %v2488_v37 = vpop.trf.xlu1 }
 0x43c   : > { %v5100_v49 = vmul.f32 0.25, %v5080_v14  ;;  %v5093_v27 = vrot.slane %v5092_v24, 1  ;;  %v5118_v50 = vsel %vm5117_vm6, %v5099_v21, %v5116_v26  ;;  %v6437_v21 = vrot.slane %v2697_v16, %v6184_v28 }
 0x43d   : > { %v5101_v29 = vmul.f32 0.25, %v5087_v25 }
 0x43e   : > { %v5094_v30 = vadd.f32 %v5093_v27, %v5092_v24  ;;  %v5120_v32 = vsel %vm5119_vm7, %v5100_v49, %v5118_v50 }
 0x43f   : > { %v5122_v34 = vsel %vm5121_vm8, %v5101_v29, %v5120_v32  ;;  %v2552_v39 = vpop.trf.xlu1 }
 0x440   : > { %v5102_v33 = vmul.f32 0.25, %v5094_v30  ;;  %v2712_v56 = vcombine.low %v2488_v37, %v2552_v39  ;;  %v2713_v7 = vcombine.high %v2488_v37, %v2552_v39 }
 0x442   : > { %v5124_v35 = vsel %vm5123_vm9, %v5102_v33, %v5122_v34  ;;  %v2720_v61 = vrot.slane %v2712_v56, %v6184_v28  ;;  %v6434_v11 = vrot.slane %v2713_v7, %v6184_v28 }
 0x443   : > { %5126 = vst.msk [vmem:[%s6411_s11] sm:$0xff] %vm1198_vm1, %v5124_v35  ;;  %v2616_v53 = vpop.trf.xlu1 }
 0x444   : > { %v2760_v9 = vcombine.low %v2704_v62, %v2720_v61  ;;  %v2761_v24 = vcombine.high %v2704_v62, %v2720_v61  ;;  %v2776_v34 = vcombine.low %v6437_v21, %v6434_v11 }
 0x446   : > { %v2768_v23 = vrot.slane %v2760_v9, %v6188_v41  ;;  %v2775_v33 = vrot.slane %v2761_v24, %v6188_v41  ;;  %v2784_v61 = vrot.slane %v2776_v34, %v6188_v41 }
 0x49e   : > { %v6415_v40 = vpop.trf.xlu0 }
 0x4a2   : > { %v3204_v47 = vpop.trf.xlu1 }
 0x4a3   : > { %v6417_v43 = vpop.trf.xlu0 }
 0x4a4   : > { %v3412_v15 = vcombine.low %v6415_v40, %v6417_v43  ;;  %v3413_v56 = vcombine.high %v6415_v40, %v6417_v43 }
 0x4a6   : > { %v3420_v30 = vrot.slane %v3412_v15, %v6184_v28  ;;  %v3427_v40 = vrot.slane %v3413_v56, %v6184_v28 }
 0x4a7   : > { %v6419_v48 = vpop.trf.xlu0 }
 0x4ab   : > { %v3332_v52 = vpop.trf.xlu1  ;;  %v6421_v55 = vpop.trf.xlu0 }
 0x4ac   : > { %v3444_v22 = vcombine.low %v6419_v48, %v6421_v55  ;;  %v3445_v58 = vcombine.high %v6419_v48, %v6421_v55 }
 0x4ae   : > { %v3452_v32 = vrot.slane %v3444_v22, %v6184_v28  ;;  %v3459_v43 = vrot.slane %v3445_v58, %v6184_v28 }
 0x4af   : > { %v3396_v59 = vpop.trf.xlu1  ;;  %v3268_v60 = vpop.trf.xlu0 }
 0x4b0   : > { %v3460_v46 = vcombine.low %v3332_v52, %v3396_v59  ;;  %v3428_v3 = vcombine.low %v3204_v47, %v3268_v60  ;;  %v3461_v35 = vcombine.high %v3332_v52, %v3396_v59  ;;  %v3429_v36 = vcombine.high %v3204_v47, %v3268_v60 }
 0x4b2   : > { %v3468_v25 = vrot.slane %v3460_v46, %v6184_v28  ;;  %v3436_v26 = vrot.slane %v3428_v3, %v6184_v28  ;;  %v3475_v62 = vrot.slane %v3461_v35, %v6184_v28  ;;  %v3443_v47 = vrot.slane %v3429_v36, %v6184_v28 }
 0x4b3   : > { %v2680_v63 = vpop.trf.xlu1  ;;  %v2648_v0 = vpop.trf.xlu0 }
 0x4b4   : > { %v2744_v57 = vcombine.low %v2616_v53, %v2680_v63  ;;  %v2745_v42 = vcombine.high %v2616_v53, %v2680_v63  ;;  %v2728_v5 = vcombine.low %v2584_v54, %v2648_v0  ;;  %v2729_v6 = vcombine.high %v2584_v54, %v2648_v0 }
 0x4b5   : > { %v3476_v37 = vcombine.low %v3420_v30, %v3436_v26  ;;  %v3508_v53 = vcombine.low %v3452_v32, %v3468_v25  ;;  %v3477_v52 = vcombine.high %v3420_v30, %v3436_v26  ;;  %v3509_v59 = vcombine.high %v3452_v32, %v3468_v25 }
 0x4b6   : > { %v2752_v17 = vrot.slane %v2744_v57, %v6184_v28  ;;  %v2736_v4 = vrot.slane %v2728_v5, %v6184_v28  ;;  %v6428_v8 = vrot.slane %v2745_v42, %v6184_v28  ;;  %v6431_v45 = vrot.slane %v2729_v6, %v6184_v28 }
 0x4b7   : > { %v3484_v0 = vrot.slane %v3476_v37, %v6188_v41  ;;  %v3516_v57 = vrot.slane %v3508_v53, %v6188_v41  ;;  %v3491_v48 = vrot.slane %v3477_v52, %v6188_v41  ;;  %v3523_v55 = vrot.slane %v3509_v59, %v6188_v41 }
 0x4b8   : > { %v2792_v10 = vcombine.low %v2736_v4, %v2752_v17  ;;  %v2793_v12 = vcombine.high %v2736_v4, %v2752_v17  ;;  %v2808_v50 = vcombine.low %v6431_v45, %v6428_v8  ;;  %v3492_v6 = vcombine.low %v3427_v40, %v3443_v47 }
 0x4b9   : > { %v3541_v42 = vcombine.high %v3484_v0, %v3516_v57  ;;  %v3540_v5 = vcombine.low %v3484_v0, %v3516_v57  ;;  %v3524_v7 = vcombine.low %v3459_v43, %v3475_v62  ;;  %v3543_v16 = vcombine.high %v3491_v48, %v3523_v55 }
 0x4ba   : > { %v2800_v14 = vrot.slane %v2792_v10, %v6188_v41  ;;  %v2807_v29 = vrot.slane %v2793_v12, %v6188_v41  ;;  %v2816_v39 = vrot.slane %v2808_v50, %v6188_v41  ;;  %v3542_v17 = vcombine.low %v3491_v48, %v3523_v55 }
 0x4bb   : > { %v3500_v4 = vrot.slane %v3492_v6, %v6188_v41  ;;  %v3532_v9 = vrot.slane %v3524_v7, %v6188_v41  ;;  %v3493_v46 = vcombine.high %v3427_v40, %v3443_v47  ;;  %v3525_v3 = vcombine.high %v3459_v43, %v3475_v62 }
 0x4bc   : > { %v2825_v49 = vcombine.high %v2768_v23, %v2800_v14  ;;  %v2824_v27 = vcombine.low %v2768_v23, %v2800_v14  ;;  %v2827_v38 = vcombine.high %v2775_v33, %v2807_v29  ;;  %v2826_v54 = vcombine.low %v2775_v33, %v2807_v29 }
 0x4bd   : > { %v2829_v60 = vcombine.high %v2784_v61, %v2816_v39  ;;  %v2828_v63 = vcombine.low %v2784_v61, %v2816_v39  ;;  %v2809_v10 = vcombine.high %v6431_v45, %v6428_v8  ;;  %v3545_v12 = vcombine.high %v3500_v4, %v3532_v9 }
 0x4be   : > { %2864 = vxpose.xlu1.b32.start.end [1/1] (short) (narrow) %v2825_v49, 8  ;;  %2832 = vxpose.xlu0.b32.start.end [1/1] (short) (narrow) %v2824_v27, 8  ;;  %v3544_v15 = vcombine.low %v3500_v4, %v3532_v9  ;;  %v3507_v22 = vrot.slane %v3493_v46, %v6188_v41  ;;  %v3539_v23 = vrot.slane %v3525_v3, %v6188_v41 }
 0x4bf   : > { %v2777_v14 = vcombine.high %v6437_v21, %v6434_v11  ;;  %v2823_v26 = vrot.slane %v2809_v10, %v6188_v41 }
 0x4c0   : > { %v3547_v24 = vcombine.high %v3507_v22, %v3539_v23  ;;  %v3546_v25 = vcombine.low %v3507_v22, %v3539_v23 }
 0x4c1   : > { %v2791_v49 = vrot.slane %v2777_v14, %v6188_v41 }
 0x4c2   : > { %2928 = vxpose.xlu1.b32.start.end [1/1] (short) (narrow) %v2827_v38, 8  ;;  %2896 = vxpose.xlu0.b32.start.end [1/1] (short) (narrow) %v2826_v54, 8 }
 0x4c3   : > { %v2831_v8 = vcombine.high %v2791_v49, %v2823_v26  ;;  %v2830_v45 = vcombine.low %v2791_v49, %v2823_v26 }
 0x4c6   : > { %2992 = vxpose.xlu1.b32.start.end [1/1] (short) (narrow) %v2829_v60, 8  ;;  %2960 = vxpose.xlu0.b32.start.end [1/1] (short) (narrow) %v2828_v63, 8 }
 0x4ca   : > { %3580 = vxpose.xlu1.b32.start.end [1/1] (short) (narrow) %v3541_v42, 8  ;;  %3548 = vxpose.xlu0.b32.start.end [1/1] (short) (narrow) %v3540_v5, 8 }
 0x4ce   : > { %3644 = vxpose.xlu1.b32.start.end [1/1] (short) (narrow) %v3543_v16, 8  ;;  %3612 = vxpose.xlu0.b32.start.end [1/1] (short) (narrow) %v3542_v17, 8 }
 0x4d2   : > { %3708 = vxpose.xlu1.b32.start.end [1/1] (short) (narrow) %v3545_v12, 8  ;;  %3676 = vxpose.xlu0.b32.start.end [1/1] (short) (narrow) %v3544_v15, 8 }
 0x4d6   : > { %3772 = vxpose.xlu1.b32.start.end [1/1] (short) (narrow) %v3547_v24, 8  ;;  %3740 = vxpose.xlu0.b32.start.end [1/1] (short) (narrow) %v3546_v25, 8 }
 0x4da   : > { %3056 = vxpose.xlu1.b32.start.end [1/1] (short) (narrow) %v2831_v8, 8  ;;  %3024 = vxpose.xlu0.b32.start.end [1/1] (short) (narrow) %v2830_v45, 8 }
 0x53a   : > { %v2880_v27 = vpop.trf.xlu1  ;;  %v2848_v29 = vpop.trf.xlu0 }
 0x53e   : > { %v2944_v50 = vpop.trf.xlu1  ;;  %v2912_v30 = vpop.trf.xlu0 }
 0x53f   : > { %v3096_v39 = vcombine.low %v2880_v27, %v2944_v50  ;;  %v3088_v53 = vcombine.low %v2848_v29, %v2912_v30  ;;  %v5689_v30 = vld [vmem:[#allocation8] sm:$0xff] }
 0x541   : > { %v3103_v59 = vrot.slane %v3096_v39, %v6184_v28  ;;  %v3095_v60 = vrot.slane %v3088_v53, %v6184_v28 }
 0x542   : > { %v3008_v32 = vpop.trf.xlu1  ;;  %v2976_v33 = vpop.trf.xlu0 }
 0x543   : > { %v3120_v5 = vcombine.low %v3095_v60, %v3103_v59  ;;  %v3121_v22 = vcombine.high %v3095_v60, %v3103_v59 }
 0x545   : > { %v3128_v23 = vrot.slane %v3120_v5, %v6188_v41  ;;  %v3135_v27 = vrot.slane %v3121_v22, %v6188_v41 }
 0x546   : > { %v3596_v34 = vpop.trf.xlu1  ;;  %v3564_v11 = vpop.trf.xlu0 }
 0x54a   : > { %v3660_v21 = vpop.trf.xlu1  ;;  %v3628_v35 = vpop.trf.xlu0 }
 0x54b   : > { %v3812_v36 = vcombine.low %v3596_v34, %v3660_v21  ;;  %v3804_v37 = vcombine.low %v3564_v11, %v3628_v35  ;;  %v5692_v34 = vld [vmem:[#allocation8 + $0x18] sm:$0xff] }
 0x54d   : > { %v3819_v56 = vrot.slane %v3812_v36, %v6184_v28  ;;  %v3811_v58 = vrot.slane %v3804_v37, %v6184_v28 }
 0x54e   : > { %v3724_v38 = vpop.trf.xlu1  ;;  %v3692_v54 = vpop.trf.xlu0 }
 0x54f   : > { %v3836_v63 = vcombine.low %v3811_v58, %v3819_v56  ;;  %v3837_v9 = vcombine.high %v3811_v58, %v3819_v56 }
 0x551   : > { %v3844_v7 = vrot.slane %v3836_v63, %v6188_v41  ;;  %v3851_v24 = vrot.slane %v3837_v9, %v6188_v41 }
 0x552   : > { %v3788_v61 = vpop.trf.xlu1  ;;  %v3756_v62 = vpop.trf.xlu0 }
 0x553   : > { %v3828_v47 = vcombine.low %v3724_v38, %v3788_v61  ;;  %v3820_v52 = vcombine.low %v3692_v54, %v3756_v62 }
 0x555   : > { %v3835_v0 = vrot.slane %v3828_v47, %v6184_v28  ;;  %v3827_v57 = vrot.slane %v3820_v52, %v6184_v28 }
 0x556   : > { %v3072_v40 = vpop.trf.xlu1  ;;  %v3040_v43 = vpop.trf.xlu0 }
 0x557   : > { %v3852_v48 = vcombine.low %v3827_v57, %v3835_v0  ;;  %v3112_v55 = vcombine.low %v3008_v32, %v3072_v40  ;;  %v3104_v42 = vcombine.low %v2976_v33, %v3040_v43  ;;  %v3853_v6 = vcombine.high %v3827_v57, %v3835_v0  ;;  %v5690_v32 = vld [vmem:[#allocation8 + $0x8] sm:$0xff]  ;;  %v5691_v33 = vld [vmem:[#allocation8 + $0x10] sm:$0xff] }
 0x559   : > { %v3860_v16 = vrot.slane %v3852_v48, %v6188_v41  ;;  %v3119_v17 = vrot.slane %v3112_v55, %v6184_v28  ;;  %v3111_v4 = vrot.slane %v3104_v42, %v6184_v28  ;;  %v3867_v15 = vrot.slane %v3853_v6, %v6188_v41 }
 0x55b   : > { %v3136_v46 = vcombine.low %v3111_v4, %v3119_v17  ;;  %v3137_v3 = vcombine.high %v3111_v4, %v3119_v17  ;;  %v3868_v10 = vcombine.low %v3844_v7, %v3860_v16  ;;  %v3869_v12 = vcombine.high %v3844_v7, %v3860_v16 }
 0x55c   : > { %v3870_v8 = vcombine.low %v3851_v24, %v3867_v15  ;;  %v3871_v45 = vcombine.high %v3851_v24, %v3867_v15 }
 0x55d   : > { %v3144_v14 = vrot.slane %v3136_v46, %v6188_v41  ;;  %5495 = vmatpush3.msra.mxu0 %v3868_v10  ;;  %5500 = vmatpush3.msra.mxu1 %v3869_v12  ;;  %v3151_v25 = vrot.slane %v3137_v3, %v6188_v41 }
 0x55e   : > { %5504 = vmatprep.subr.mxu0 %v5937_v18  ;;  %5509 = vmatprep.subr.mxu1 %v5937_v18 }
 0x55f   : > { %v3152_v26 = vcombine.low %v3128_v23, %v3144_v14  ;;  %v3153_v49 = vcombine.high %v3128_v23, %v3144_v14  ;;  %v3154_v29 = vcombine.low %v3135_v27, %v3151_v25  ;;  %v3155_v50 = vcombine.high %v3135_v27, %v3151_v25 }
 0x561   : > { %5497 = vmatmul.mubr.msk.f32.vlgmr.msra.gmra.mxu0 %vm1198_vm1, %v3152_v26  ;;  %5502 = vmatmul.mubr.msk.f32.vlgmr.msra.gmra.mxu1 %vm1198_vm1, %v3153_v49 }
 0x562   : > { %5505 = vmatpush3.msra.mxu0 %v3870_v8  ;;  %5510 = vmatpush3.msra.mxu1 %v3871_v45 }
 0x563   : > { %5506 = vmatprep.mubr.msk.f32.mxu0 %vm5938_vm0, %v5937_v18  ;;  %5511 = vmatprep.mubr.msk.f32.mxu1 %vm5938_vm0, %v5937_v18 }
 0x564   : > { %5514 = vmatprep.subr.mxu0 %v5937_v18  ;;  %5519 = vmatprep.subr.mxu1 %v5937_v18 }
 0x565   : > { %5507 = vmatmul.mubr.msk.f32.vlgmr.msra.gmra.mxu0 %vm1198_vm1, %v3154_v29  ;;  %5512 = vmatmul.mubr.msk.f32.vlgmr.msra.gmra.mxu1 %vm1198_vm1, %v3155_v50 }
 0x566   : > { %5515 = vmatpush3.msra.mxu0 %v5689_v30  ;;  %5516 = vmatprep.mubr.msk.f32.mxu0 %vm5938_vm0, %v5937_v18 }
 0x567   : > { %5520 = vmatpush3.msra.mxu1 %v5690_v32  ;;  %5521 = vmatprep.mubr.msk.f32.mxu1 %vm5938_vm0, %v5937_v18 }
 0x568   : > { %5524 = vmatprep.subr.mxu0 %v5937_v18  ;;  %5529 = vmatprep.subr.mxu1 %v5937_v18 }
 0x569   : > { %5517 = vmatmul.mubr.msk.f32.vlgmr.msra.gmra.mxu0 %vm1198_vm1, %v6356_v44  ;;  %5522 = vmatmul.mubr.msk.f32.vlgmr.msra.gmra.mxu1 %vm1198_vm1, %v6363_v1  ;;  %v5693_v44 = vld [vmem:[#allocation8 + $0x20] sm:$0xff]  ;;  %v5694_v1 = vld [vmem:[#allocation8 + $0x28] sm:$0xff] }
 0x56a   : > { %5525 = vmatpush3.msra.mxu0 %v5691_v33  ;;  %5526 = vmatprep.mubr.msk.f32.mxu0 %vm5938_vm0, %v5937_v18 }
 0x56b   : > { %5530 = vmatpush3.msra.mxu1 %v5692_v34  ;;  %5531 = vmatprep.mubr.msk.f32.mxu1 %vm5938_vm0, %v5937_v18 }
 0x56c   : > { %5534 = vmatprep.subr.mxu0 %v5937_v18  ;;  %5539 = vmatprep.subr.mxu1 %v5937_v18 }
 0x56d   : > { %5527 = vmatmul.mubr.msk.f32.vlgmr.msra.gmra.mxu0 %vm1198_vm1, %v6366_v2  ;;  %5532 = vmatmul.mubr.msk.f32.vlgmr.msra.gmra.mxu1 %vm1198_vm1, %v6378_v13  ;;  %v5695_v2 = vld [vmem:[#allocation8 + $0x30] sm:$0xff]  ;;  %v5696_v13 = vld [vmem:[#allocation8 + $0x38] sm:$0xff] }
 0x56e   : > { %5535 = vmatpush3.msra.mxu0 %v5693_v44  ;;  %5536 = vmatprep.mubr.msk.f32.mxu0 %vm5938_vm0, %v5937_v18 }
 0x56f   : > { %5540 = vmatpush3.msra.mxu1 %v5694_v1  ;;  %5541 = vmatprep.mubr.msk.f32.mxu1 %vm5938_vm0, %v5937_v18 }
 0x570   : > { %5544 = vmatprep.subr.mxu0 %v5937_v18  ;;  %5549 = vmatprep.subr.mxu1 %v5937_v18 }
 0x571   : > { %5537 = vmatmul.mubr.msk.f32.vlgmr.msra.gmra.mxu0 %vm1198_vm1, %v6375_v20  ;;  %5542 = vmatmul.mubr.msk.f32.vlgmr.msra.gmra.mxu1 %vm1198_vm1, %v6387_v19 }
 0x572   : > { %5545 = vmatpush3.msra.mxu0 %v5695_v2  ;;  %5546 = vmatprep.mubr.msk.f32.mxu0 %vm5938_vm0, %v5937_v18 }
 0x573   : > { %5550 = vmatpush3.msra.mxu1 %v5696_v13  ;;  %5551 = vmatprep.mubr.msk.f32.mxu1 %vm5938_vm0, %v5937_v18 }
 0x575   : > { %5547 = vmatmul.mubr.msk.f32.vlgmr.msra.gmra.mxu0 %vm1198_vm1, %v6390_v31  ;;  %5552 = vmatmul.mubr.msk.f32.vlgmr.msra.gmra.mxu1 %vm1198_vm1, %v6399_v51 }
 0x621   : > { %v3941_v20 = vpop.f32.mrf.mxu0  ;;  %v4014_v11 = vpop.f32.mrf.mxu1 }
 0x622   : > { %4196 = vxpose.xlu1.b32.start.end [1/1] (short) (narrow) %v4014_v11, 8  ;;  %4164 = vxpose.xlu0.b32.start.end [1/1] (short) (narrow) %v3941_v20, 8 }
 0x623   : > { %v5498_v19 = vpop.f32.mrf.mxu0  ;;  %v5503_v21 = vpop.f32.mrf.mxu1 }
 0x625   : > { %v4087_v35 = vpop.f32.mrf.mxu0  ;;  %v4160_v36 = vpop.f32.mrf.mxu1 }
 0x626   : > { %4260 = vxpose.xlu1.b32.start.end [1/1] (short) (narrow) %v4160_v36, 8  ;;  %4228 = vxpose.xlu0.b32.start.end [1/1] (short) (narrow) %v4087_v35, 8 }
 0x627   : > { %v5508_v37 = vpop.f32.mrf.mxu0  ;;  %v5513_v38 = vpop.f32.mrf.mxu1 }
 0x629   : > { %v4429_v54 = vpop.f32.mrf.mxu0  ;;  %v4502_v39 = vpop.f32.mrf.mxu1 }
 0x62b   : > { %v5518_v53 = vpop.f32.mrf.mxu0  ;;  %v5523_v56 = vpop.f32.mrf.mxu1 }
 0x62d   : > { %v4575_v31 = vpop.f32.mrf.mxu0  ;;  %v4648_v58 = vpop.f32.mrf.mxu1 }
 0x62f   : > { %v5528_v61 = vpop.f32.mrf.mxu0  ;;  %v5533_v51 = vpop.f32.mrf.mxu1 }
 0x631   : > { %v4721_v62 = vpop.f32.mrf.mxu0  ;;  %v4794_v47 = vpop.f32.mrf.mxu1 }
 0x633   : > { %v5538_v52 = vpop.f32.mrf.mxu0  ;;  %v5543_v59 = vpop.f32.mrf.mxu1 }
 0x635   : > { %v4867_v60 = vpop.f32.mrf.mxu0  ;;  %v4940_v63 = vpop.f32.mrf.mxu1 }
 0x637   : > { %v5548_v0 = vpop.f32.mrf.mxu0  ;;  %v5553_v57 = vpop.f32.mrf.mxu1 }
 0x69e   : > { %v4212_v40 = vpop.trf.xlu1  ;;  %v4180_v43 = vpop.trf.xlu0 }
 0x6a2   : > { %v4276_v48 = vpop.trf.xlu1  ;;  %v4244_v55 = vpop.trf.xlu0 }
 0x6a3   : > { %v4308_v42 = vcombine.low %v4212_v40, %v4276_v48  ;;  %v4309_v5 = vcombine.high %v4212_v40, %v4276_v48  ;;  %v4292_v6 = vcombine.low %v4180_v43, %v4244_v55  ;;  %v4293_v7 = vcombine.high %v4180_v43, %v4244_v55 }
 0x6a5   : > { %v4316_v16 = vrot.slane %v4308_v42, %v6184_v28  ;;  %v4323_v17 = vrot.slane %v4309_v5, %v6184_v28  ;;  %v4300_v4 = vrot.slane %v4292_v6, %v6184_v28  ;;  %v4307_v9 = vrot.slane %v4293_v7, %v6184_v28 }
 0x6a7   : > { %v4324_v46 = vcombine.low %v4300_v4, %v4316_v16  ;;  %v4325_v3 = vcombine.high %v4300_v4, %v4316_v16  ;;  %v4340_v10 = vcombine.low %v4307_v9, %v4323_v17  ;;  %v4341_v12 = vcombine.high %v4307_v9, %v4323_v17 }
 0x6a9   : > { %v4332_v15 = vrot.slane %v4324_v46, %v6188_v41  ;;  %v4339_v22 = vrot.slane %v4325_v3, %v6188_v41  ;;  %v4348_v23 = vrot.slane %v4340_v10, %v6188_v41  ;;  %v4355_v14 = vrot.slane %v4341_v12, %v6188_v41 }
 0x6ab   : > { %v4356_v24 = vcombine.high %v4332_v15, %v5937_v18  ;;  %v4357_v25 = vcombine.high %v4339_v22, %v5937_v18  ;;  %v4358_v26 = vcombine.high %v4348_v23, %v5937_v18  ;;  %v4359_v49 = vcombine.high %v4355_v14, %v5937_v18 }
 0x6ac   : > { %v4944_v8 = vadd.f32 %v4429_v54, %v4332_v15  ;;  %v4946_v45 = vadd.f32 %v4575_v31, %v4339_v22  ;;  %v4948_v27 = vadd.f32 %v4721_v62, %v4348_v23  ;;  %v4950_v29 = vadd.f32 %v4867_v60, %v4355_v14 }
 0x6ad   : > { %v4945_v50 = vadd.f32 %v4502_v39, %v4356_v24  ;;  %v4947_v30 = vadd.f32 %v4648_v58, %v4357_v25  ;;  %v4949_v32 = vadd.f32 %v4794_v47, %v4358_v26  ;;  %v4951_v33 = vadd.f32 %v4940_v63, %v4359_v49 }
 0x6ae   : > { %v4952_v34 = vcombine.low %v4944_v8, %v4946_v45  ;;  %v4968_v44 = vcombine.low %v4948_v27, %v4950_v29 }
 0x6af   : > { %v4960_v1 = vcombine.low %v4945_v50, %v4947_v30  ;;  %v4976_v2 = vcombine.low %v4949_v32, %v4951_v33 }
 0x6b0   : > { %v4959_v13 = vrot.slane %v4952_v34, %v6184_v28  ;;  %v4975_v20 = vrot.slane %v4968_v44, %v6184_v28 }
 0x6b1   : > { %v4967_v18 = vrot.slane %v4960_v1, %v6184_v28  ;;  %v4983_v11 = vrot.slane %v4976_v2, %v6184_v28 }
 0x6b3   : > { %v4985_v19 = vcombine.high %v4959_v13, %v4967_v18  ;;  %v5001_v21 = vcombine.high %v4975_v20, %v4983_v11  ;;  %v4984_v35 = vcombine.low %v4959_v13, %v4967_v18  ;;  %v5000_v36 = vcombine.low %v4975_v20, %v4983_v11 }
 0x6b5   : > { %v4999_v37 = vrot.slane %v4985_v19, %v6188_v41  ;;  %v5015_v38 = vrot.slane %v5001_v21, %v6188_v41  ;;  %v4992_v54 = vrot.slane %v4984_v35, %v6188_v41  ;;  %v5008_v28 = vrot.slane %v5000_v36, %v6188_v41 }
 0x6b6   : > { %5820 = shalt.err (!%p5817_p6)
}
 0x6b7   : > { %s5821_s27 = scalar_lea.hbm %s6567_s1, 128  ;;  %s5825_s23 = scalar_lea.hbm %s6646_s5, 256 }
 0x6b8   : > { %p5822_p9 = scmp.ne.s32.totalorder %s6567_s1, %s5821_s27  ;;  %p5826_p13 = scmp.lt.s32.totalorder %s6567_s1, %s6646_s5 }
 0x6b9   : > { %p5827_p7 = scmp.lt.s32.totalorder %s5825_s23, %s5821_s27 }
 0x6ba   : > { %p5823_p4 = pnand %p5822_p9, %p6070_p12 }
 0x6bb   : > { %p5828_p2 = por %p5827_p7, %p5826_p13 }
 0x6bc   : > { %p5824_p3 = pneg %p5823_p4 }
 0x6be   : > { %p5829_p10 = pnand %p5828_p2, %p5824_p3 }
 0x6c0   : > { %5832 = shalt.err (!%p5829_p10)
}
 0x6c1   : > { %5565 = dma.vmem_to_hbm [thread:$0]  (%p6070_p12), %s5162_s22, 128, %s6567_s1, %s5133_s24   ;;  %v5018_v41 = vcombine.low %v4999_v37, %v5015_v38  ;;  %v5017_v39 = vcombine.high %v4992_v54, %v5008_v28  ;;  %v5016_v53 = vcombine.low %v4992_v54, %v5008_v28  ;;  %v5019_v56 = vcombine.high %v4999_v37, %v5015_v38 }
 0x6c2   : > { %s5940_s6 = smov 16   ;;  %s5941_s13 = smov 8   ;;  %vm5033_vm10 = vcmask 130048   ;;  %vm5035_vm11 = vcmask 195584   ;;  %vm5037_vm12 = vcmask 261120  }
 0x6c3   : > { %5025 = vrot.lane.b32.xlu1 %v5018_v41, %s5940_s6  ;;  %5021 = vrot.lane.b32.xlu0 %v5017_v39, %s5941_s13  ;;  %s5942_s14 = smov 24   ;;  %s364_s11 = scalar_lea.vmem [#allocation10], %s5346_s8 }
 0x6c4   : > { %s5147_s26 = sshll.u32 %s364_s11, 4  ;;  %s6599_s22 = scalar_lea.hbm %s6645_s4, %s5382_s16  ;;  %s5148_s26 = int_to_ptr.vmem [resolvable:$true] %s5147_s26 }
 0x6c5   : > { %s5128_s24 = scalar_lea.sflag [#allocation4], %s6139_s28  ;;  %s5833_s25 = scalar_lea.vmem %s5148_s26, 128 }
 0x6c6   : > { %p5834_p11 = scmp.ne.s32.totalorder %s5148_s26, %s5833_s25  ;;  %s5943_s8 = smov [#allocation10]  }
 0x6c7   : > { %5029 = vrot.lane.b32.xlu1 %v5019_v56, %s5942_s14  ;;  %s5837_s7 = sshll.u32 %s5943_s8, 4  ;;  %s5838_s7 = int_to_ptr.vmem [resolvable:$false] %s5837_s7 }
 0x6c8   : > { %p5835_p0 = pnand %p5834_p11, %p6070_p12  ;;  %s5839_s17 = scalar_lea.vmem %s5838_s7, 256 }
 0x6c9   : > { %p5840_p5 = scmp.lt.s32.totalorder %s5148_s26, %s5838_s7  ;;  %p5841_p1 = scmp.lt.s32.totalorder %s5839_s17, %s5833_s25 }
 0x6ca   : > { %p5836_p8 = pneg %p5835_p0 }
 0x6cb   : > { %p5842_p6 = por %p5841_p1, %p5840_p5 }
 0x6cd   : > { %p5843_p9 = pnand %p5842_p6, %p5836_p8 }
 0x735   : > { %v5026_v31 = vpop.permute.xlu1 %5025  ;;  %v5022_v58 = vpop.permute.xlu0 %5021 }
 0x736   : > { %v5032_v61 = vsel %vm1198_vm1, %v5016_v53, %v5022_v58 }
 0x737   : > { %v5034_v62 = vsel %vm5033_vm10, %v5032_v61, %v5026_v31 }
 0x739   : > { %v5030_v51 = vpop.permute.xlu1 %5029 }
 0x73a   : > { %v5036_v47 = vsel %vm5035_vm11, %v5034_v62, %v5030_v51 }
 0x73b   : > { %5038 = vst.msk [vmem:[%s364_s11] sm:$0xff] %vm5037_vm12, %v5036_v47 }
 0x73c   : > { %5846 = shalt.err (!%p5843_p9)
}
 0x73d   : > { %s5847_s21 = scalar_lea.hbm %s6599_s22, 128  ;;  %s5851_s15 = scalar_lea.hbm %s6645_s4, 256 }
 0x73e   : > { %p5848_p4 = scmp.ne.s32.totalorder %s6599_s22, %s5847_s21  ;;  %p5852_p7 = scmp.lt.s32.totalorder %s6599_s22, %s6645_s4 }
 0x73f   : > { %p5853_p2 = scmp.lt.s32.totalorder %s5851_s15, %s5847_s21 }
 0x740   : > { %p5849_p3 = pnand %p5848_p4, %p6070_p12 }
 0x741   : > { %p5854_p10 = por %p5853_p2, %p5852_p7 }
 0x742   : > { %p5850_p13 = pneg %p5849_p3 }
 0x744   : > { %p5855_p11 = pnand %p5854_p10, %p5850_p13 }
 0x746   : > { %5858 = shalt.err (!%p5855_p11)
}
 0x747   : > { %5564 = dma.vmem_to_hbm [thread:$0]  (%p6070_p12), %s5148_s26, 128, %s6599_s22, %s5128_s24  }
 0x748 PF: > { %s6683_s20 = sld [smem:[#allocation20_spill]]  ;;  %s5173_s23 = sand.u32 1, %s5905_s18  }
 0x749   : > { %p6684_p0 = scmp.ne.s32.totalorder %s6672_s12, 0  ;;  %s5174_s29 = scalar_lea.sflag [#allocation4], %s5173_s23 }
 0x74e   : > { %p6685_p8 = scmp.ge.s32.totalorder %s6683_s20, 2 }
 0x750   : > { %p5583_p5 = pnand %p6685_p8, %p6684_p0 }
 0x752   : > { %p5584_p1 = pneg %p5583_p5 }
 0x754   : > { %5896 = dma.done.wait (%p5584_p1), %s5174_s29, 128  }
 0x755   : > { %5898 = vsyncadd (%p5584_p1), %s5174_s29, 4294967168  ;;  %s5183_s0 = scalar_lea.sflag [#allocation12], %s5173_s23 }
 0x756   : > { %5900 = dma.done.wait (%p5584_p1), %s5183_s0, 128  }
 0x757   : > { %5902 = vsyncadd (%p5584_p1), %s5183_s0, 4294967168  ;;  %s29_s23 = sadd.s32 1, %s6683_s20   ;;  %s6686_s10 = sld [smem:[#allocation18_spill]] }
 0x758   : > { %p26_p6 = scmp.ge.s32.totalorder %s29_s23, 4   ;;  %s6687_s20 = sld [smem:[#allocation22_spill]] }
 0x759   : > { %s6688_s21 = sld [smem:[#allocation19_spill]]  ;;  %s6690_s18 = smov %s5909_s19 }
 0x75a   : > { %s6689_s22 = sld [smem:[#allocation21_spill]]  ;;  %28 = sbr.rel (!%p26_p6) target bundleno = 14 (0xe), region = 127 }
 0x75d   : > { %s6691_s19 = smov %s6686_s10 }
 0x75f   :  { %5188 = vsyncpa [#allocation3], 1 }
 0x760   :  { %5190 = vsyncpa [#allocation3 + $0x1], 1 }
 0x761   :  { %5191 = vsyncpa [#allocation6], 1 }
 0x762   :  { %5193 = vsyncpa [#allocation6 + $0x1], 1 }
 0x763   :  { %5194 = vsyncpa [#allocation9], 1 }
 0x764   :  { %5195 = vsyncpa [#allocation4], 1 }
 0x765   :  { %5197 = vsyncpa [#allocation4 + $0x1], 1 }
 0x766   :  { %5198 = vsyncpa [#allocation12], 1 }
 0x767   :  { %5200 = vsyncpa [#allocation12 + $0x1], 1 }

</bundles_post_ra>
